<compile_context>
chip_gen: v5e
topology: v5e:2x2
jax: 0.10.0
libtpu: 0.0.40
codegen_flags: <defaults>
</compile_context>

<pallas_src>
import math
from functools import partial

import numpy as np
import jax
import jax.numpy as jnp
from jax.experimental import pallas as pl
from jax.experimental.pallas import tpu as pltpu

NUM_CLASSES = 80
NO = 5 + NUM_CLASSES      # 85
NA = 3
ACT_DTYPE = jnp.bfloat16

ANCHORS = np.array(
    [[10.0, 13], [16, 30], [33, 23], [30, 61], [62, 45],
     [59, 119], [116, 90], [156, 198], [373, 326]], dtype=np.float32)


# ---------------------------------------------------------------------------
# Generation-dependent VMEM budget & tiling helpers
# ---------------------------------------------------------------------------
def _round_up(x, m):
    return ((x + m - 1) // m) * m


def _vmem_limit_bytes():
    try:
        cap = int(pltpu.get_tpu_info().vmem_capacity_bytes)
    except Exception:
        cap = 64 * 1024 * 1024                      # assume v7x-sized part
    lim = cap - 16 * 1024 * 1024                    # leave headroom
    return int(min(max(lim, 32 * 1024 * 1024), 112 * 1024 * 1024))


VMEM_LIMIT = _vmem_limit_bytes()


def _choose_tm(M, cap=512):
    if M >= cap:
        return cap
    if M >= 16:
        return (M // 16) * 16                       # bf16 sublane packing
    if M >= 8:
        return 8
    return M


def _choose_tn(Np, cap=512):
    if Np < 128:
        return Np
    for t in (cap, 256, 128):
        if Np % t == 0:
            return t
    return 128


def _choose_tk(K, cap=1024):
    if K % 128 != 0:
        return K                                    # full-dim block (legal)
    best, t = 128, 128
    while t <= min(K, cap):
        if K % t == 0:
            best = t
        t += 128
    return best


def _adjust_parallel(M, Np, TM, TN):
    """Keep >=2 parallel (M,N) tiles so v7x's second TensorCore gets work."""
    if pl.cdiv(M, TM) * pl.cdiv(Np, TN) >= 2:
        return TM, TN
    if TN >= 256:
        return TM, TN // 2
    if TM >= 16:
        return max(8, (TM // 2) // 8 * 8), TN
    return TM, TN


# ---------------------------------------------------------------------------
# Pallas kernels
# ---------------------------------------------------------------------------
def _mm_kernel(*refs, leaky, has_skip):
    """acc += A@W over the K grid axis; last K step: scale/shift, LeakyReLU,
    optional fused residual skip, then store."""
    if has_skip:
        a_ref, w_ref, s_ref, b_ref, skip_ref, o_ref, acc_ref = refs
    else:
        a_ref, w_ref, s_ref, b_ref, o_ref, acc_ref = refs
        skip_ref = None
    k = pl.program_id(2)

    @pl.when(k == 0)
    def _():
        acc_ref[...] = jnp.zeros_like(acc_ref)

    acc_ref[...] += jnp.dot(a_ref[...], w_ref[...],
                            preferred_element_type=jnp.float32)

    @pl.when(k == pl.num_programs(2) - 1)
    def _():
        y = acc_ref[...] * s_ref[...] + b_ref[...]
        if leaky:
            y = jnp.where(y > 0, y, 0.1 * y)
        if has_skip:
            y = y + skip_ref[...].astype(jnp.float32)
        o_ref[...] = y.astype(o_ref.dtype)


def _mm_multi_kernel(*refs, n_src, leaky):
    """Fused 'route-concat -> 1x1 conv': K grid axis enumerates the concat
    sources; each source/weight-slice pair is accumulated into one scratch."""
    a_refs = refs[:n_src]
    w_refs = refs[n_src:2 * n_src]
    s_ref, b_ref, o_ref, acc_ref = refs[2 * n_src:]
    k = pl.program_id(2)

    @pl.when(k == 0)
    def _():
        acc_ref[...] = jnp.zeros_like(acc_ref)

    for s in range(n_src):
        @pl.when(k == s)
        def _(s=s):
            acc_ref[...] += jnp.dot(a_refs[s][...], w_refs[s][...],
                                    preferred_element_type=jnp.float32)

    @pl.when(k == n_src - 1)
    def _():
        y = acc_ref[...] * s_ref[...] + b_ref[...]
        if leaky:
            y = jnp.where(y > 0, y, 0.1 * y)
        o_ref[...] = y.astype(o_ref.dtype)


def _conv3_kernel(*refs, H, W, leaky, has_skip):
    """Fused 3x3 stride-1 conv: zero halo built in VMEM, 9 (dy,dx) tap
    matmuls accumulated in f32 over the Cin grid axis; BN/LeakyReLU/skip
    epilogue on the last Cin tile."""
    if has_skip:
        x_ref, w_ref, s_ref, b_ref, skip_ref, o_ref, acc_ref, xp_ref = refs
    else:
        x_ref, w_ref, s_ref, b_ref, o_ref, acc_ref, xp_ref = refs
        skip_ref = None
    k = pl.program_id(2)

    @pl.when(k == 0)
    def _():
        acc_ref[...] = jnp.zeros_like(acc_ref)

    # Build the zero-padded halo in VMEM (no HBM pad pass).
    xp_ref[...] = jnp.zeros_like(xp_ref)
    xp_ref[:, 1:H + 1, 1:W + 1, :] = x_ref[...]
    xp = xp_ref[...]                                 # (1, H+2, W+2, TCin)

    for dx in range(3):
        xc = xp[:, :, dx:dx + W, :]                  # (1, H+2, W, TCin)
        for dy in range(3):
            a = xc[:, dy:dy + H].reshape(H * W, xc.shape[-1])
            acc_ref[...] += jnp.dot(a, w_ref[dy, dx, :, :],
                                    preferred_element_type=jnp.float32)

    @pl.when(k == pl.num_programs(2) - 1)
    def _():
        y = acc_ref[...] * s_ref[...] + b_ref[...]
        if leaky:
            y = jnp.where(y > 0, y, 0.1 * y)
        y = y.reshape(1, H, W, y.shape[-1])
        if has_skip:
            y = y + skip_ref[...].astype(jnp.float32)
        o_ref[...] = y.astype(o_ref.dtype)


def _pool5_kernel(x_ref, o_ref, xp_ref, *, H, W):
    """5x5 stride-1 'same' max pool; -inf border built in VMEM scratch,
    separable column-max then row-max."""
    xp_ref[...] = jnp.full(xp_ref.shape, -jnp.inf, xp_ref.dtype)
    xp_ref[:, 2:H + 2, 2:W + 2, :] = x_ref[...]
    x = xp_ref[...]                                  # (1, H+4, W+4, TC)
    cm = x[:, :, 0:W, :]
    for dx in range(1, 5):
        cm = jnp.maximum(cm, x[:, :, dx:dx + W, :])
    r = cm[:, 0:H]
    for dy in range(1, 5):
        r = jnp.maximum(r, cm[:, dy:dy + H])
    o_ref[...] = r


def _add_kernel(a_ref, b_ref, o_ref):
    o_ref[...] = (a_ref[...].astype(jnp.float32) +
                  b_ref[...].astype(jnp.float32)).astype(o_ref.dtype)


def _yolo_kernel(p_ref, o_ref, *, stride, nx, ny, anchors, tm):
    """Eval-mode YOLO decode; grid / anchor values computed in-kernel from
    iota.  Blocks are 128 lanes wide (lane-dense loads/stores)."""
    i = pl.program_id(0)
    p = p_ref[...].astype(jnp.float32)               # (TM, 128)
    rows = jax.lax.broadcasted_iota(jnp.int32, (tm, 1), 0) + i * tm
    x_idx = (rows % nx).astype(jnp.float32)
    y_idx = ((rows // nx) % ny).astype(jnp.float32)
    a_idx = (rows // (nx * ny)) % NA
    aw = jnp.where(a_idx == 0, anchors[0][0],
                   jnp.where(a_idx == 1, anchors[1][0], anchors[2][0]))
    ah = jnp.where(a_idx == 0, anchors[0][1],
                   jnp.where(a_idx == 1, anchors[1][1], anchors[2][1]))
    c = jax.lax.broadcasted_iota(jnp.int32, p.shape, 1)
    sig = 1.0 / (1.0 + jnp.exp(-p))
    grid_v = jnp.where(c == 0, x_idx, y_idx)
    anch_v = jnp.where(c == 2, aw, ah)
    xy = (sig + grid_v) * stride
    is_wh = jnp.logical_and(c >= 2, c < 4)
    wh = jnp.exp(jnp.where(is_wh, p, 0.0)) * anch_v
    o_ref[...] = jnp.where(c < 2, xy, jnp.where(c < 4, wh, sig))


# ---------------------------------------------------------------------------
# Kernel wrappers
# ---------------------------------------------------------------------------
def matmul_scale_bias_act(a, w, scale, shift, *, leaky, skip=None,
                          out_dtype=ACT_DTYPE):
    M, K = a.shape
    Kw, Np = w.shape
    assert Kw == K, (Kw, K)
    TM, TN = _adjust_parallel(M, Np, _choose_tm(M), _choose_tn(Np))
    TK = _choose_tk(K)
    in_arrays = [a, w, scale, shift]
    in_specs = [
        pl.BlockSpec((TM, TK), lambda i, j, k: (i, k)),
        pl.BlockSpec((TK, TN), lambda i, j, k: (k, j)),
        pl.BlockSpec((1, TN), lambda i, j, k: (0, j)),
        pl.BlockSpec((1, TN), lambda i, j, k: (0, j)),
    ]
    has_skip = skip is not None
    if has_skip:
        in_arrays.append(skip)
        in_specs.append(pl.BlockSpec((TM, TN), lambda i, j, k: (i, j)))
    return pl.pallas_call(
        partial(_mm_kernel, leaky=leaky, has_skip=has_skip),
        out_shape=jax.ShapeDtypeStruct((M, Np), out_dtype),
        grid=(pl.cdiv(M, TM), pl.cdiv(Np, TN), K // TK),
        in_specs=in_specs,
        out_specs=pl.BlockSpec((TM, TN), lambda i, j, k: (i, j)),
        scratch_shapes=[pltpu.VMEM((TM, TN), jnp.float32)],
        compiler_params=pltpu.CompilerParams(
            dimension_semantics=("parallel", "parallel", "arbitrary"),
            vmem_limit_bytes=VMEM_LIMIT),
    )(*in_arrays)


def matmul_concat_scale_bias_act(a_list, w_list, scale, shift, *, leaky,
                                 out_dtype=ACT_DTYPE):
    M = a_list[0].shape[0]
    Np = w_list[0].shape[1]
    TM, TN = _adjust_parallel(M, Np, _choose_tm(M), _choose_tn(Np))
    n_src = len(a_list)
    in_specs = ([pl.BlockSpec((TM, a.shape[1]), lambda i, j, k: (i, 0))
                 for a in a_list]
                + [pl.BlockSpec((ws.shape[0], TN), lambda i, j, k: (0, j))
                   for ws in w_list]
                + [pl.BlockSpec((1, TN), lambda i, j, k: (0, j))] * 2)
    return pl.pallas_call(
        partial(_mm_multi_kernel, n_src=n_src, leaky=leaky),
        out_shape=jax.ShapeDtypeStruct((M, Np), out_dtype),
        grid=(pl.cdiv(M, TM), pl.cdiv(Np, TN), n_src),
        in_specs=in_specs,
        out_specs=pl.BlockSpec((TM, TN), lambda i, j, k: (i, j)),
        scratch_shapes=[pltpu.VMEM((TM, TN), jnp.float32)],
        compiler_params=pltpu.CompilerParams(
            dimension_semantics=("parallel", "parallel", "arbitrary"),
            vmem_limit_bytes=VMEM_LIMIT),
    )(*a_list, *w_list, scale, shift)


def _conv3_tci(cin):
    if cin < 128:
        return cin
    return 256 if cin % 256 == 0 else 128


def _conv3_feasible(x_shape, w3):
    if w3 is None:
        return False
    _, H, W, cin = x_shape
    if W % 8 != 0:          # keep the in-kernel reshape layout-preserving
        return False
    tci = _conv3_tci(cin)
    tn = _choose_tn(w3.shape[-1])
    vmem = (3 * (H + 2) * (W + 2) * tci * 2          # x blocks + halo scratch
            + 2 * 9 * tci * tn * 2                   # weight blocks
            + H * W * tn * 4                         # f32 acc
            + 6 * H * W * tn * 2)                    # out / skip blocks
    return vmem < VMEM_LIMIT // 2


def conv3x3_fused(x, w3, scale, shift, *, leaky, skip=None,
                  out_dtype=ACT_DTYPE):
    N, H, W, cin = x.shape
    Np = w3.shape[-1]
    TCin = _conv3_tci(cin)
    TN = _choose_tn(Np)
    in_arrays = [x, w3, scale, shift]
    in_specs = [
        pl.BlockSpec((1, H, W, TCin), lambda n, j, k: (n, 0, 0, k)),
        pl.BlockSpec((3, 3, TCin, TN), lambda n, j, k: (0, 0, k, j)),
        pl.BlockSpec((1, TN), lambda n, j, k: (0, j)),
        pl.BlockSpec((1, TN), lambda n, j, k: (0, j)),
    ]
    has_skip = skip is not None
    if has_skip:
        in_arrays.append(skip)
        in_specs.append(pl.BlockSpec((1, H, W, TN), lambda n, j, k: (n, 0, 0, j)))
    return pl.pallas_call(
        partial(_conv3_kernel, H=H, W=W, leaky=leaky, has_skip=has_skip),
        out_shape=jax.ShapeDtypeStruct((N, H, W, Np), out_dtype),
        grid=(N, Np // TN, cin // TCin),
        in_specs=in_specs,
        out_specs=pl.BlockSpec((1, H, W, TN), lambda n, j, k: (n, 0, 0, j)),
        scratch_shapes=[pltpu.VMEM((H * W, TN), jnp.float32),
                        pltpu.VMEM((1, H + 2, W + 2, TCin), x.dtype)],
        compiler_params=pltpu.CompilerParams(
            dimension_semantics=("parallel", "parallel", "arbitrary"),
            vmem_limit_bytes=VMEM_LIMIT),
    )(*in_arrays)


def _im2col(x, k, stride):
    """Fallback lowering of a conv to a (M, k*k*Cin) patches matrix."""
    N, H, W, C = x.shape
    pad = (k - 1) // 2
    Ho = (H + 2 * pad - k) // stride + 1
    Wo = (W + 2 * pad - k) // stride + 1
    if k == 1 and stride == 1:
        return x.reshape(N * H * W, C), Ho, Wo
    xp = jnp.pad(x, ((0, 0), (pad, pad), (pad, pad), (0, 0)))
    cols = []
    for dy in range(k):
        for dx in range(k):
            cols.append(xp[:, dy:dy + stride * Ho:stride,
                           dx:dx + stride * Wo:stride, :])
    patches = jnp.concatenate(cols, axis=-1)
    return patches.reshape(N * Ho * Wo, k * k * C), Ho, Wo


def conv_bn_act(x, lp, k, stride, cin, cout, leaky, skip=None):
    """x is an NHWC tensor, or a tuple of NHWC tensors (route-concat fused
    into this 1x1 conv)."""
    w3, wmat, scale, shift = lp
    if isinstance(x, tuple):
        assert k == 1 and stride == 1 and skip is None
        N, H, W, _ = x[0].shape
        M = N * H * W
        a_list = [t.reshape(M, t.shape[-1]) for t in x]
        offs = np.cumsum([0] + [t.shape[-1] for t in x])
        w_list = [wmat[int(offs[i]):int(offs[i + 1])] for i in range(len(x))]
        out = matmul_concat_scale_bias_act(a_list, w_list, scale, shift,
                                           leaky=leaky)
        out = out.reshape(N, H, W, -1)
    elif k == 3 and stride == 1 and _conv3_feasible(x.shape, w3):
        out = conv3x3_fused(x, w3, scale, shift, leaky=leaky, skip=skip)
    else:
        N = x.shape[0]
        patches, Ho, Wo = _im2col(x, k, stride)
        Kp = wmat.shape[0]
        if patches.shape[1] != Kp:
            patches = jnp.pad(patches, ((0, 0), (0, Kp - patches.shape[1])))
        skip2 = skip.reshape(patches.shape[0], -1) if skip is not None else None
        out = matmul_scale_bias_act(patches, wmat, scale, shift,
                                    leaky=leaky, skip=skip2)
        out = out.reshape(N, Ho, Wo, -1)
    if out.shape[-1] != cout:               # only the 255-channel heads
        out = out[..., :cout]
    return out


def residual_add(a, b):
    """Fallback elementwise add (shortcuts are normally fused into the conv)."""
    shape = a.shape
    C = shape[-1]
    M = a.size // C
    TM = _choose_tm(M)
    out = pl.pallas_call(
        _add_kernel,
        out_shape=jax.ShapeDtypeStruct((M, C), a.dtype),
        grid=(pl.cdiv(M, TM),),
        in_specs=[pl.BlockSpec((TM, C), lambda i: (i, 0)),
                  pl.BlockSpec((TM, C), lambda i: (i, 0))],
        out_specs=pl.BlockSpec((TM, C), lambda i: (i, 0)),
        compiler_params=pltpu.CompilerParams(
            dimension_semantics=("parallel",),
            vmem_limit_bytes=VMEM_LIMIT),
    )(a.reshape(M, C), b.reshape(M, C))
    return out.reshape(shape)


def maxpool5_s1(x):
    N, H, W, C = x.shape
    TC = 256 if C % 256 == 0 else (128 if C % 128 == 0 else C)
    return pl.pallas_call(
        partial(_pool5_kernel, H=H, W=W),
        out_shape=jax.ShapeDtypeStruct((N, H, W, C), x.dtype),
        grid=(N, C // TC),
        in_specs=[pl.BlockSpec((1, H, W, TC), lambda n, c: (n, 0, 0, c))],
        out_specs=pl.BlockSpec((1, H, W, TC), lambda n, c: (n, 0, 0, c)),
        scratch_shapes=[pltpu.VMEM((1, H + 4, W + 4, TC), x.dtype)],
        compiler_params=pltpu.CompilerParams(
            dimension_semantics=("parallel", "parallel"),
            vmem_limit_bytes=VMEM_LIMIT),
    )(x)


def maxpool_s1(x, k):
    """Stride-1 'same' max pool; k in {5,9,13} as a cascade of k=5 pools."""
    assert (k - 1) % 4 == 0
    for _ in range((k - 1) // 4):
        x = maxpool5_s1(x)
    return x


def yolo_decode(x_nhwc, anchors_slice, img_max_side):
    bs, ny, nx, _ = x_nhwc.shape
    stride = float(img_max_side) / float(max(nx, ny))
    # (bs,ny,nx,255) -> (bs,na,ny,nx,85): matches the NCHW view/permute.
    p = x_nhwc.reshape(bs, ny, nx, NA, NO).transpose(0, 3, 1, 2, 4)
    R = bs * NA * ny * nx
    p2 = p.reshape(R, NO)
    TM = min(256, _round_up(R, 8))
    Rp = _round_up(R, TM)
    NOp = 128                                   # lane-dense blocks
    p2 = jnp.pad(p2, ((0, Rp - R), (0, NOp - NO)))
    anchors_t = tuple((float(a[0]), float(a[1]))
                      for a in np.asarray(anchors_slice))
    io = pl.pallas_call(
        partial(_yolo_kernel, stride=stride, nx=nx, ny=ny,
                anchors=anchors_t, tm=TM),
        out_shape=jax.ShapeDtypeStruct((Rp, NOp), jnp.float32),
        grid=(Rp // TM,),
        in_specs=[pl.BlockSpec((TM, NOp), lambda i: (i, 0))],
        out_specs=pl.BlockSpec((TM, NOp), lambda i: (i, 0)),
        compiler_params=pltpu.CompilerParams(
            dimension_semantics=("parallel",),
            vmem_limit_bytes=VMEM_LIMIT),
    )(p2)
    return io[:R, :NO].reshape(bs, NA * ny * nx, NO)


# ---------------------------------------------------------------------------
# Model definition (module list mirrors YOLOv3_SPP.__init__)
# ---------------------------------------------------------------------------
def build_module_list():
    ml = []

    def cbl(cin, cout, k, s=1):
        ml.append(("cbl", cin, cout, k, s))

    def shortcut():
        ml.append(("shortcut", [-3]))

    # ---- DarkNet53 backbone (indices 0..74) ----
    cbl(3, 32, 3, 1)
    cbl(32, 64, 3, 2)
    cbl(64, 32, 1); cbl(32, 64, 3); shortcut()
    cbl(64, 128, 3, 2)
    for _ in range(2):
        cbl(128, 64, 1); cbl(64, 128, 3); shortcut()
    cbl(128, 256, 3, 2)
    for _ in range(8):
        cbl(256, 128, 1); cbl(128, 256, 3); shortcut()
    cbl(256, 512, 3, 2)
    for _ in range(8):
        cbl(512, 256, 1); cbl(256, 512, 3); shortcut()
    cbl(512, 1024, 3, 2)
    for _ in range(4):
        cbl(1024, 512, 1); cbl(512, 1024, 3); shortcut()
    assert len(ml) == 75

    # ---- SPP neck ----
    for cin, cout, k in [(1024, 512, 1), (512, 1024, 3), (1024, 512, 1)]:
        cbl(cin, cout, k)
    for mk, idxs in [(5, [-2]), (9, [-4]), (13, [-1, -3, -5, -6])]:
        ml.append(("maxpool", mk))
        ml.append(("route", idxs))

    # ---- head 1 (stride 32) ----
    for cin, cout, k in [(2048, 512, 1), (512, 1024, 3),
                         (1024, 512, 1), (512, 1024, 3)]:
        cbl(cin, cout, k)
    ml.append(("conv", 1024, 255, 1))
    ml.append(("yolo", 6, 9))

    # ---- head 2 (stride 16) ----
    ml.append(("route", [-4]))
    cbl(512, 256, 1)
    ml.append(("upsample",))
    ml.append(("route", [-1, 61]))
    for cin, cout, k in [(768, 256, 1), (256, 512, 3), (512, 256, 1),
                         (256, 512, 3), (512, 256, 1), (256, 512, 3)]:
        cbl(cin, cout, k)
    ml.append(("conv", 512, 255, 1))
    ml.append(("yolo", 3, 6))

    # ---- head 3 (stride 8) ----
    ml.append(("route", [-4]))
    cbl(256, 128, 1)
    ml.append(("upsample",))
    ml.append(("route", [-1, 36]))
    for cin, cout, k in [(384, 128, 1), (128, 256, 3), (256, 128, 1),
                         (128, 256, 3), (256, 128, 1), (128, 256, 3)]:
        cbl(cin, cout, k)
    ml.append(("conv", 256, 255, 1))
    ml.append(("yolo", 0, 3))
    return ml


def connection_layer_idx(module_list):
    conn = []
    for idx, m in enumerate(module_list):
        if m[0] in ("route", "shortcut"):
            for li in m[1]:
                mark = li if li > 0 else idx + li
                if mark not in conn:
                    conn.append(mark)
    return set(conn)


def _prep_conv_params(w_oihw, scale, shift, *, stride):
    """OIHW weight -> (fused-3x3 w, im2col/1x1 wmat, scale, shift).
    Only 255-channel heads get Cout padded (to 256)."""
    cout, cin, k, _ = w_oihw.shape
    Np = cout if cout < 128 else _round_up(cout, 128)
    w_hwio = jnp.transpose(w_oihw, (2, 3, 1, 0))            # (k,k,cin,cout)
    scale_p = jnp.pad(scale.reshape(1, -1).astype(jnp.float32),
                      ((0, 0), (0, Np - cout)))
    shift_p = jnp.pad(shift.reshape(1, -1).astype(jnp.float32),
                      ((0, 0), (0, Np - cout)))
    w3 = None
    if k == 3 and stride == 1 and cin >= 32:
        w3 = jnp.pad(w_hwio, ((0, 0), (0, 0), (0, 0),
                              (0, Np - cout))).astype(jnp.bfloat16)
    K = k * k * cin
    Kp = K if (k == 1 or K % 128 == 0) else _round_up(K, 128)
    wmat = jnp.pad(w_hwio.reshape(K, cout),
                   ((0, Kp - K), (0, Np - cout))).astype(jnp.bfloat16)
    return w3, wmat, scale_p, shift_p


def init_params(module_list, key, num_classes=NUM_CLASSES):
    params = {}
    yolo_prev_conv = {idx - 1 for idx, m in enumerate(module_list)
                      if m[0] == "yolo"}
    for idx, m in enumerate(module_list):
        k_layer = jax.random.fold_in(key, idx)
        if m[0] == "cbl":
            _, cin, cout, k, s = m
            kw, kg, kb, km, kv = jax.random.split(k_layer, 5)
            fan_in = cin * k * k
            w = jax.random.normal(kw, (cout, cin, k, k),
                                  jnp.float32) / math.sqrt(fan_in)
            gamma = 1.0 + 0.1 * jax.random.normal(kg, (cout,), jnp.float32)
            beta = 0.05 * jax.random.normal(kb, (cout,), jnp.float32)
            rmean = 0.05 * jax.random.normal(km, (cout,), jnp.float32)
            rvar = 0.9 + 0.2 * jax.random.uniform(kv, (cout,), jnp.float32)
            scale = gamma / jnp.sqrt(rvar + 1e-5)           # eval-mode BN fold
            shift = beta - rmean * scale
            params[idx] = _prep_conv_params(w, scale, shift, stride=s)
        elif m[0] == "conv":
            _, cin, cout, k = m
            kw, kb = jax.random.split(k_layer, 2)
            fan_in = cin * k * k
            w = jax.random.normal(kw, (cout, cin, k, k),
                                  jnp.float32) / math.sqrt(fan_in)
            bias = 0.1 * jax.random.normal(kb, (cout,), jnp.float32)
            if idx in yolo_prev_conv:
                # reproduce YOLOv3_SPP._initialize_weights bias adjustment
                b = bias.reshape(NA, -1)
                b = b.at[:, 4].add(-4.5 - b[:, 4].mean())
                b = b.at[:, 5:].add(math.log(1.0 / (num_classes - 0.99))
                                    - b[:, 5:].mean())
                bias = b.reshape(-1)
            params[idx] = _prep_conv_params(
                w, jnp.ones((cout,), jnp.float32), bias, stride=1)
    return params


def forward(x_nchw, params, module_list, conn):
    img_max_side = max(x_nchw.shape[-2:])
    x = jnp.transpose(x_nchw, (0, 2, 3, 1)).astype(ACT_DTYPE)   # NCHW -> NHWC
    outputs = []
    yolo_out = []
    n_mod = len(module_list)
    fused_shortcut = False
    for idx, m in enumerate(module_list):
        kind = m[0]
        if kind == "cbl":
            _, cin, cout, k, s = m
            skip = None
            # Fuse the upcoming residual add into this conv's epilogue.
            if (idx + 1 < n_mod and module_list[idx + 1][0] == "shortcut"
                    and idx not in conn):
                skip = outputs[(idx + 1) + module_list[idx + 1][1][0]]
            x = conv_bn_act(x, params[idx], k, s, cin, cout,
                            leaky=True, skip=skip)
            fused_shortcut = skip is not None
        elif kind == "conv":
            _, cin, cout, k = m
            x = conv_bn_act(x, params[idx], k, 1, cin, cout, leaky=False)
        elif kind == "shortcut":
            if not fused_shortcut:
                x = residual_add(x, outputs[m[1][0]])
            fused_shortcut = False
        elif kind == "route":
            srcs = [outputs[i] for i in m[1]]
            if len(srcs) == 1:
                x = srcs[0]
            elif (idx + 1 < n_mod and module_list[idx + 1][0] == "cbl"
                  and module_list[idx + 1][3] == 1):
                x = tuple(srcs)          # concat fused into the next 1x1 conv
            else:
                x = jnp.concatenate(srcs, axis=-1)
        elif kind == "maxpool":
            mk = m[1]
            prev = module_list[idx - 2] if idx >= 2 else None
            if (mk > 5 and prev is not None and prev[0] == "maxpool"
                    and prev[1] == mk - 4 and outputs[idx - 2] is not None):
                # SPP cascade: pool_k(x) == pool5(pool_{k-4}(x))
                x = maxpool5_s1(outputs[idx - 2])
            else:
                x = maxpool_s1(x, mk)
        elif kind == "upsample":
            x = jnp.repeat(jnp.repeat(x, 2, axis=1), 2, axis=2)   # nearest x2
        elif kind == "yolo":
            out = yolo_decode(x, ANCHORS[m[1]:m[2]], img_max_side)
            yolo_out.append(out)
            outputs.append(None)
            continue
        if idx in conn:
            outputs.append(jnp.concatenate(x, axis=-1)
                           if isinstance(x, tuple) else x)
        else:
            outputs.append(None)
    # eval-mode return: concat of decoded yolo outputs along dim 1
    return jnp.concatenate(yolo_out, axis=1)


# ---------------------------------------------------------------------------
if __name__ == "__main__":
    key = jax.random.PRNGKey(0)
    pkey, xkey = jax.random.split(key)

    module_list = build_module_list()
    conn = connection_layer_idx(module_list)
    params = init_params(module_list, pkey)

    # small input: batch=2, 3x32x32 (divisible by 32 so the three yolo grids
    # are 1x1, 2x2 and 4x4)
    x = jax.random.normal(xkey, (2, 3, 32, 32), jnp.float32)

    out = forward(x, params, module_list, conn)
    out = jax.block_until_ready(out)

    expected_rows = NA * (1 * 1 + 2 * 2 + 4 * 4)     # 63
    assert out.shape == (2, expected_rows, NO), out.shape
    assert bool(jnp.all(jnp.isfinite(out)))
    print("KERNEL_OK")
</pallas_src>

<mosaic_0001>
module attributes {stable_mosaic.version = 11 : i64} {
  func.func @_mm_kernel(%arg0: i32, %arg1: i32, %arg2: i32, %arg3: memref<512x128xbf16, #tpu.memory_space<vmem>>, %arg4: memref<128x32xbf16, #tpu.memory_space<vmem>>, %arg5: memref<1x32xf32, #tpu.memory_space<vmem>>, %arg6: memref<1x32xf32, #tpu.memory_space<vmem>>, %arg7: memref<512x32xbf16, #tpu.memory_space<vmem>>, %arg8: memref<512x32xf32, #tpu.memory_space<vmem>>) attributes {dimension_semantics = [#tpu.dimension_semantics<parallel>, #tpu.dimension_semantics<parallel>, #tpu.dimension_semantics<arbitrary>], iteration_bounds = array<i64: 4, 1, 1>, scalar_prefetch = 0 : i64, scratch_operands = 1 : i64, tpu.core_type = #tpu.core_type<tc>, window_params = [{transform_indices = @transform_0, window_bounds = array<i64: 512, 128>}, {transform_indices = @transform_1, window_bounds = array<i64: 128, 32>}, {transform_indices = @transform_2, window_bounds = array<i64: 1, 32>}, {transform_indices = @transform_3, window_bounds = array<i64: 1, 32>}, {transform_indices = @transform_4, window_bounds = array<i64: 512, 32>}]} {
    %c0_i32 = arith.constant 0 : i32
    %0 = arith.cmpi eq, %arg2, %c0_i32 : i32
    %1 = arith.extui %0 : i1 to i32
    %c0_i32_0 = arith.constant 0 : i32
    %2 = arith.cmpi ne, %1, %c0_i32_0 : i32
    scf.if %2 {
      %cst_10 = arith.constant 0.000000e+00 : f32
      %12 = vector.broadcast %cst_10 : f32 to vector<512x32xf32>
      %c0_11 = arith.constant 0 : index
      %c0_12 = arith.constant 0 : index
      %13 = vector.load %arg8[%c0_11, %c0_12] : memref<512x32xf32, #tpu.memory_space<vmem>>, vector<512x32xf32>
      tpu.vector_store %arg8[%c0_11, %c0_12], %12 {strides = array<i32>} : memref<512x32xf32, #tpu.memory_space<vmem>>, vector<512x32xf32>,
    } else {
    }
    %c0 = arith.constant 0 : index
    %c0_1 = arith.constant 0 : index
    %3 = vector.load %arg8[%c0, %c0_1] : memref<512x32xf32, #tpu.memory_space<vmem>>, vector<512x32xf32>
    %c0_2 = arith.constant 0 : index
    %c0_3 = arith.constant 0 : index
    %4 = vector.load %arg3[%c0_2, %c0_3] : memref<512x128xbf16, #tpu.memory_space<vmem>>, vector<512x128xbf16>
    %c0_4 = arith.constant 0 : index
    %c0_5 = arith.constant 0 : index
    %5 = vector.load %arg4[%c0_4, %c0_5] : memref<128x32xbf16, #tpu.memory_space<vmem>>, vector<128x32xbf16>
    %cst = arith.constant dense<0.000000e+00> : vector<512x32xf32>
    %6 = tpu.matmul %4, %5, %cst {dimension_numbers = #tpu.dot_dimension_numbers<[1], [0], [0], [1], [0, 0, 1, 1], [], []>} : vector<512x128xbf16>, vector<128x32xbf16>, vector<512x32xf32> -> vector<512x32xf32>
    %7 = arith.addf %3, %6 : vector<512x32xf32>
    %c0_6 = arith.constant 0 : index
    %c0_7 = arith.constant 0 : index
    %8 = vector.load %arg8[%c0_6, %c0_7] : memref<512x32xf32, #tpu.memory_space<vmem>>, vector<512x32xf32>
    tpu.vector_store %arg8[%c0_6, %c0_7], %7 {strides = array<i32>} : memref<512x32xf32, #tpu.memory_space<vmem>>, vector<512x32xf32>,
    %c0_i32_8 = arith.constant 0 : i32
    %9 = arith.cmpi eq, %arg2, %c0_i32_8 : i32
    %10 = arith.extui %9 : i1 to i32
    %c0_i32_9 = arith.constant 0 : i32
    %11 = arith.cmpi ne, %10, %c0_i32_9 : i32
    scf.if %11 {
      %c0_10 = arith.constant 0 : index
      %c0_11 = arith.constant 0 : index
      %12 = vector.load %arg8[%c0_10, %c0_11] : memref<512x32xf32, #tpu.memory_space<vmem>>, vector<512x32xf32>
      %c0_12 = arith.constant 0 : index
      %c0_13 = arith.constant 0 : index
      %13 = vector.load %arg5[%c0_12, %c0_13] : memref<1x32xf32, #tpu.memory_space<vmem>>, vector<1x32xf32>
      %14 = vector.broadcast %13 : vector<1x32xf32> to vector<512x32xf32>
      %15 = arith.mulf %12, %14 : vector<512x32xf32>
      %c0_14 = arith.constant 0 : index
      %c0_15 = arith.constant 0 : index
      %16 = vector.load %arg6[%c0_14, %c0_15] : memref<1x32xf32, #tpu.memory_space<vmem>>, vector<1x32xf32>
      %17 = vector.broadcast %16 : vector<1x32xf32> to vector<512x32xf32>
      %18 = arith.addf %15, %17 : vector<512x32xf32>
      %cst_16 = arith.constant 0.000000e+00 : f32
      %19 = vector.broadcast %cst_16 : f32 to vector<512x32xf32>
      %20 = arith.cmpf ogt, %18, %19 : vector<512x32xf32>
      %cst_17 = arith.constant 1.000000e-01 : f32
      %21 = vector.broadcast %cst_17 : f32 to vector<512x32xf32>
      %22 = arith.mulf %21, %18 : vector<512x32xf32>
      %23 = arith.select %20, %18, %22 : vector<512x32xi1>, vector<512x32xf32>
      %24 = arith.truncf %23 : vector<512x32xf32> to vector<512x32xbf16>
      %c0_18 = arith.constant 0 : index
      %c0_19 = arith.constant 0 : index
      %25 = vector.load %arg7[%c0_18, %c0_19] : memref<512x32xbf16, #tpu.memory_space<vmem>>, vector<512x32xbf16>
      tpu.vector_store %arg7[%c0_18, %c0_19], %24 {strides = array<i32>} : memref<512x32xbf16, #tpu.memory_space<vmem>>, vector<512x32xbf16>,
    } else {
    }
    return
  }
  func.func @transform_0(%arg0: i32, %arg1: i32, %arg2: i32) -> (i32, i32) {
    %c0_i32 = arith.constant 0 : i32
    return %arg0, %arg2 : i32, i32
  }
  func.func @transform_1(%arg0: i32, %arg1: i32, %arg2: i32) -> (i32, i32) {
    %c0_i32 = arith.constant 0 : i32
    return %arg2, %arg1 : i32, i32
  }
  func.func @transform_2(%arg0: i32, %arg1: i32, %arg2: i32) -> (i32, i32) {
    %c0_i32 = arith.constant 0 : i32
    %c0_i32_0 = arith.constant 0 : i32
    return %c0_i32, %arg1 : i32, i32
  }
  func.func @transform_3(%arg0: i32, %arg1: i32, %arg2: i32) -> (i32, i32) {
    %c0_i32 = arith.constant 0 : i32
    %c0_i32_0 = arith.constant 0 : i32
    return %c0_i32, %arg1 : i32, i32
  }
  func.func @transform_4(%arg0: i32, %arg1: i32, %arg2: i32) -> (i32, i32) {
    %c0_i32 = arith.constant 0 : i32
    return %arg0, %arg1 : i32, i32
  }
}

</mosaic_0001>

<bundles_post_ra>
// kernel: tpu_custom_call.1
= control target key start
LH: loop header
LB: loop body
LE: loop exit
PB: predicated region body
PF: predicated region fallthrough
CT: control target
= control target key end

     0   :  { %9 = vsyncpa [#allocation4], 0  ;;  %s2804_s0 = inlined_call_operand.hbm [shape: bf16[2048,128], index: 0, kind: input, shape index: {}]   ;;  %s2805_s1 = inlined_call_operand.vmem [shape: bf16[128,32], index: 1, kind: input, shape index: {}]   ;;  %s2806_s2 = inlined_call_operand.vmem [shape: f32[1,32], index: 2, kind: input, shape index: {}]   ;;  %s2807_s3 = inlined_call_operand.vmem [shape: f32[1,32], index: 3, kind: input, shape index: {}]   ;;  %s2808_s4 = inlined_call_operand.vmem [shape: bf16[2048,32], index: 4, kind: output, shape index: {}]  }
   0x1   :  { %11 = vsyncpa [#allocation4 + $0x1], 0  ;;  %s2134_s15 = smov 0   ;;  %s2136_s16 = smov 0  }
   0x2   :  { %s2138_s17 = smov 0   ;;  %s2140_s18 = smov 0  }
   0x3   :  { %s2142_s19 = smov 0   ;;  %s2144_s20 = smov 0  }
   0x4 LB: > { %s1721_s21 = sadd.s32 4294967295, %s2104_s20   ;;  %s36_s22 = sadd.s32 1, %s2100_s19  ;;  %s2104_s20 = sphi %s2144_s20, %s17_s20   ;;  %s2100_s19 = sphi %s2142_s19, %s2815_s19   ;;  %s2096_s18 = sphi %s2140_s18, %s2814_s18   ;;  %s2092_s17 = sphi %s2138_s17, %s2813_s17   ;;  %s2088_s16 = sphi %s2136_s16, %s2812_s16   ;;  %s2084_s15 = sphi %s2134_s15, %s2811_s15  }
   0x5   : > { %p38_p0 = scmp.ge.s32.totalorder %s36_s22, 4  ;;  %s45_s23 = sadd.s32 1, %s2092_s17 }
   0x6   : > { %p52_p1 = scmp.ne.s32.totalorder %s2092_s17, %s2088_s16  ;;  %p53_p2 = scmp.eq.s32.totalorder %s2104_s20, 0 }
   0x7   : > { %s2817_s22 = smov (%p38_p0, %s36_s22), 0  ;;  %p58_p4 = scmp.ne.s32.totalorder %s2088_s16, %s2084_s15 }
   0x8   : > { %p2170_p3 = por %p53_p2, %p52_p1  ;;  %s40_s25 = ssub.s32 %s2100_s19, %s2817_s22 }
   0x9   : > { %p59_p5 = scmp.eq.s32.totalorder %s1721_s21, 0  ;;  %p43_p6 = scmp.eq.s32.totalorder %s40_s25, 0 }
   0xa   : > { %p1968_p8 = scmp.lt.s32.totalorder %s2104_s20, 4  ;;  %s214_s28 = sand.u32 1, %s2092_s17  }
   0xb   : > { %p2177_p7 = por %p59_p5, %p58_p4  ;;  %s1897_s29 = sshll.u32 %s2100_s19, 8 }
   0xc   : > { %s2183_s27 = scalar_select %p43_p6, %s2092_s17, %s45_s23  }
   0xd   : > { %s1728_s30 = sshll.u32 %s214_s28, 8  ;;  %s224_s7 = scalar_lea.hbm %s2804_s0, %s1897_s29 }
   0xe   : > { %s225_s8 = sshll.u32 %s224_s7, 4  ;;  %s218_s9 = scalar_lea.vmem [#allocation3], %s1728_s30  ;;  %s226_s8 = int_to_ptr.hbm [resolvable:$true] %s225_s8 }
   0xf   : > { %s227_s10 = sshll.u32 %s218_s9, 4  ;;  %p1965_p9 = pnand %p1968_p8, %p2170_p3  ;;  %s228_s10 = int_to_ptr.vmem [resolvable:$true] %s227_s10 }
  0x10   : > { %p1731_p10 = scmp.ge.s32.totalorder %s2104_s20, 1  ;;  %p235_p11 = scmp.lt.s32.totalorder %s2104_s20, 5 }
  0x11   : > { %s215_s11 = scalar_lea.sflag [#allocation4], %s214_s28  ;;  %s2106_s12 = smov 64  }
  0x12   : > { %s2107_s13 = smov 4   ;;  %p236_p12 = pnand %p1731_p10, %p235_p11 }
  0x13   : > { %1967 = dma.hbm_to_vmem [thread:$0]  (!%p1965_p9), %s226_s8, 4096, %s228_s10, %s215_s11, %s2106_s12, %s2106_s12, %s2107_s13  }
  0x14   : > { %239 = sbr.rel (%p236_p12) target bundleno = 336 (0x150), region = 36  ;;  %s241_s14 = sand.u32 (!%p236_p12), 1, %s2088_s16  }
  0x15   : > { %s1732_s15 = sshll.u32 (!%p236_p12), %s241_s14, 8  ;;  %s242_s21 = scalar_lea.sflag (!%p236_p12), [#allocation4], %s241_s14 }
  0x16   : > { %s2195_s23 = scalar_lea.vmem (!%p236_p12), [#allocation3], %s1732_s15 }
  0x19   : > { %2079 = dma.done.wait (%p2177_p7), %s242_s21, 4096  }
  0x1a   : > { %2081 = vsyncadd (%p2177_p7), %s242_s21, 4294963200  ;;  %v1937_v0 = vld [vmem:[%s2805_s1 + $0x38] sm:$0xff]  ;;  %v1936_v1 = vld [vmem:[%s2805_s1 + $0x30] sm:$0xff]  ;;  %vm317_vm0 = vcmask 261120   ;;  %v2108_v32 = vmov 0.0   ;;  %s1733_s15 = sshll.u32 %s2096_s18, 6 }
  0x1b   : > { %766 = vmatpush.bf16.msra.mxu0 %v1937_v0  ;;  %1938 = vmatpush.bf16.msra.mxu1 %v1937_v0  ;;  %v1935_v2 = vld [vmem:[%s2805_s1 + $0x28] sm:$0xff]  ;;  %v1934_v3 = vld [vmem:[%s2805_s1 + $0x20] sm:$0xff]  ;;  %v1933_v4 = vld [vmem:[%s2805_s1 + $0x18] sm:$0xff]  ;;  %318 = vst.msk [vmem:[#allocation2] sm:$0xff] %vm317_vm0, %v2108_v32  ;;  %p305_p13 = scmp.lt.s32.totalorder %s1733_s15, 255  ;;  %vm1523_vm2 = vcmask 257024  }
  0x1c   : > { %1939 = vmatpush.bf16.msra.mxu2 %v1937_v0  ;;  %1940 = vmatpush.bf16.msra.mxu3 %v1937_v0  ;;  %v1932_v5 = vld [vmem:[%s2805_s1 + $0x10] sm:$0xff]  ;;  %v1931_v6 = vld [vmem:[%s2805_s1 + $0x8] sm:$0xff]  ;;  %v1930_v7 = vld [vmem:[%s2805_s1] sm:$0xff]  ;;  %319 = vst.msk [vmem:[#allocation2 + $0x8] sm:$0xff] %vm317_vm0, %v2108_v32 }
  0x1d   : > { %v1898_v8 = vld [vmem:[%s2195_s23] sm:$0xff]  ;;  %v1899_v12 = vld [vmem:[%s2195_s23 + $0x8] sm:$0xff]  ;;  %v1900_v16 = vld [vmem:[%s2195_s23 + $0x10] sm:$0xff]  ;;  %320 = vst.msk [vmem:[#allocation2 + $0x10] sm:$0xff] %vm317_vm0, %v2108_v32  ;;  %s2819_s15 = smov (!%p305_p13, %s1733_s15), 255 }
  0x1e   : > { %v1906_v9 = vld [vmem:[%s2195_s23 + $0x40] sm:$0xff]  ;;  %v1907_v13 = vld [vmem:[%s2195_s23 + $0x48] sm:$0xff]  ;;  %v1908_v17 = vld [vmem:[%s2195_s23 + $0x50] sm:$0xff]  ;;  %321 = vst.msk [vmem:[#allocation2 + $0x18] sm:$0xff] %vm317_vm0, %v2108_v32  ;;  %s1734_s25 = sshll.u32 %s2819_s15, 2 }
  0x1f   : > { %767 = vmatpush.bf16.msra.mxu0 %v1936_v1  ;;  %1941 = vmatpush.bf16.msra.mxu1 %v1936_v1  ;;  %v1914_v10 = vld [vmem:[%s2195_s23 + $0x80] sm:$0xff]  ;;  %v1915_v14 = vld [vmem:[%s2195_s23 + $0x88] sm:$0xff]  ;;  %v1916_v18 = vld [vmem:[%s2195_s23 + $0x90] sm:$0xff]  ;;  %322 = vst.msk [vmem:[#allocation2 + $0x20] sm:$0xff] %vm317_vm0, %v2108_v32  ;;  %s2392_s30 = scalar_lea.vmem %s2808_s4, %s1734_s25 }
  0x20   : > { %1942 = vmatpush.bf16.msra.mxu2 %v1936_v1  ;;  %1943 = vmatpush.bf16.msra.mxu3 %v1936_v1  ;;  %v1922_v11 = vld [vmem:[%s2195_s23 + $0xc0] sm:$0xff]  ;;  %v1923_v15 = vld [vmem:[%s2195_s23 + $0xc8] sm:$0xff]  ;;  %v1924_v19 = vld [vmem:[%s2195_s23 + $0xd0] sm:$0xff]  ;;  %323 = vst.msk [vmem:[#allocation2 + $0x28] sm:$0xff] %vm317_vm0, %v2108_v32 }
  0x21   : > { %v1901_v20 = vld [vmem:[%s2195_s23 + $0x18] sm:$0xff]  ;;  %v1902_v24 = vld [vmem:[%s2195_s23 + $0x20] sm:$0xff]  ;;  %v1903_v28 = vld [vmem:[%s2195_s23 + $0x28] sm:$0xff]  ;;  %324 = vst.msk [vmem:[#allocation2 + $0x30] sm:$0xff] %vm317_vm0, %v2108_v32 }
  0x22   : > { %v1909_v21 = vld [vmem:[%s2195_s23 + $0x58] sm:$0xff]  ;;  %v1910_v25 = vld [vmem:[%s2195_s23 + $0x60] sm:$0xff]  ;;  %v1911_v29 = vld [vmem:[%s2195_s23 + $0x68] sm:$0xff]  ;;  %325 = vst.msk [vmem:[#allocation2 + $0x38] sm:$0xff] %vm317_vm0, %v2108_v32 }
  0x23   : > { %768 = vmatpush.bf16.msra.mxu0 %v1935_v2  ;;  %1944 = vmatpush.bf16.msra.mxu1 %v1935_v2  ;;  %v1917_v22 = vld [vmem:[%s2195_s23 + $0x98] sm:$0xff]  ;;  %v1918_v26 = vld [vmem:[%s2195_s23 + $0xa0] sm:$0xff]  ;;  %v1919_v30 = vld [vmem:[%s2195_s23 + $0xa8] sm:$0xff]  ;;  %326 = vst.msk [vmem:[#allocation2 + $0x40] sm:$0xff] %vm317_vm0, %v2108_v32 }
  0x24   : > { %1945 = vmatpush.bf16.msra.mxu2 %v1935_v2  ;;  %1946 = vmatpush.bf16.msra.mxu3 %v1935_v2  ;;  %v1925_v23 = vld [vmem:[%s2195_s23 + $0xd8] sm:$0xff]  ;;  %v1926_v27 = vld [vmem:[%s2195_s23 + $0xe0] sm:$0xff]  ;;  %v1927_v31 = vld [vmem:[%s2195_s23 + $0xe8] sm:$0xff]  ;;  %327 = vst.msk [vmem:[#allocation2 + $0x48] sm:$0xff] %vm317_vm0, %v2108_v32 }
  0x25   : > { %v1904_v33 = vld [vmem:[%s2195_s23 + $0x30] sm:$0xff]  ;;  %328 = vst.msk [vmem:[#allocation2 + $0x50] sm:$0xff] %vm317_vm0, %v2108_v32  ;;  %v1905_v37 = vld [vmem:[%s2195_s23 + $0x38] sm:$0xff]  ;;  %v382_v41 = vld [vmem:[#allocation2] sm:$0xff] }
  0x26   : > { %v1912_v34 = vld [vmem:[%s2195_s23 + $0x70] sm:$0xff]  ;;  %329 = vst.msk [vmem:[#allocation2 + $0x58] sm:$0xff] %vm317_vm0, %v2108_v32  ;;  %v1913_v38 = vld [vmem:[%s2195_s23 + $0x78] sm:$0xff]  ;;  %v2360_v45 = vld [vmem:[%s2806_s2] ss:$0 sm:$0xff] }
  0x27   : > { %769 = vmatpush.bf16.msra.mxu0 %v1934_v3  ;;  %1947 = vmatpush.bf16.msra.mxu1 %v1934_v3  ;;  %v1920_v35 = vld [vmem:[%s2195_s23 + $0xb0] sm:$0xff]  ;;  %330 = vst.msk [vmem:[#allocation2 + $0x60] sm:$0xff] %vm317_vm0, %v2108_v32  ;;  %v1921_v39 = vld [vmem:[%s2195_s23 + $0xb8] sm:$0xff]  ;;  %v2369_v50 = vld [vmem:[%s2807_s3] ss:$0 sm:$0xff] }
  0x28   : > { %1948 = vmatpush.bf16.msra.mxu2 %v1934_v3  ;;  %1949 = vmatpush.bf16.msra.mxu3 %v1934_v3  ;;  %v1928_v36 = vld [vmem:[%s2195_s23 + $0xf0] sm:$0xff]  ;;  %331 = vst.msk [vmem:[#allocation2 + $0x68] sm:$0xff] %vm317_vm0, %v2108_v32  ;;  %v1929_v40 = vld [vmem:[%s2195_s23 + $0xf8] sm:$0xff]  ;;  %v383_v1 = vld [vmem:[#allocation2 + $0x8] sm:$0xff] }
  0x29   : > { %332 = vst.msk [vmem:[#allocation2 + $0x70] sm:$0xff] %vm317_vm0, %v2108_v32 }
  0x2a   : > { %333 = vst.msk [vmem:[#allocation2 + $0x78] sm:$0xff] %vm317_vm0, %v2108_v32 }
  0x2b   : > { %770 = vmatpush.bf16.msra.mxu0 %v1933_v4  ;;  %1950 = vmatpush.bf16.msra.mxu1 %v1933_v4  ;;  %334 = vst.msk [vmem:[#allocation2 + $0x80] sm:$0xff] %vm317_vm0, %v2108_v32 }
  0x2c   : > { %1951 = vmatpush.bf16.msra.mxu2 %v1933_v4  ;;  %1952 = vmatpush.bf16.msra.mxu3 %v1933_v4  ;;  %335 = vst.msk [vmem:[#allocation2 + $0x88] sm:$0xff] %vm317_vm0, %v2108_v32 }
  0x2d   : > { %336 = vst.msk [vmem:[#allocation2 + $0x90] sm:$0xff] %vm317_vm0, %v2108_v32 }
  0x2e   : > { %337 = vst.msk [vmem:[#allocation2 + $0x98] sm:$0xff] %vm317_vm0, %v2108_v32 }
  0x2f   : > { %771 = vmatpush.bf16.msra.mxu0 %v1932_v5  ;;  %1953 = vmatpush.bf16.msra.mxu1 %v1932_v5  ;;  %338 = vst.msk [vmem:[#allocation2 + $0xa0] sm:$0xff] %vm317_vm0, %v2108_v32 }
  0x30   : > { %1954 = vmatpush.bf16.msra.mxu2 %v1932_v5  ;;  %1955 = vmatpush.bf16.msra.mxu3 %v1932_v5  ;;  %339 = vst.msk [vmem:[#allocation2 + $0xa8] sm:$0xff] %vm317_vm0, %v2108_v32 }
  0x31   : > { %340 = vst.msk [vmem:[#allocation2 + $0xb0] sm:$0xff] %vm317_vm0, %v2108_v32 }
  0x32   : > { %341 = vst.msk [vmem:[#allocation2 + $0xb8] sm:$0xff] %vm317_vm0, %v2108_v32  ;;  %v398_v57 = vld [vmem:[#allocation2 + $0x80] sm:$0xff] }
  0x33   : > { %772 = vmatpush.bf16.msra.mxu0 %v1931_v6  ;;  %1956 = vmatpush.bf16.msra.mxu1 %v1931_v6  ;;  %342 = vst.msk [vmem:[#allocation2 + $0xc0] sm:$0xff] %vm317_vm0, %v2108_v32  ;;  %v399_v3 = vld [vmem:[#allocation2 + $0x88] sm:$0xff] }
  0x34   : > { %1957 = vmatpush.bf16.msra.mxu2 %v1931_v6  ;;  %1958 = vmatpush.bf16.msra.mxu3 %v1931_v6  ;;  %343 = vst.msk [vmem:[#allocation2 + $0xc8] sm:$0xff] %vm317_vm0, %v2108_v32 }
  0x35   : > { %344 = vst.msk [vmem:[#allocation2 + $0xd0] sm:$0xff] %vm317_vm0, %v2108_v32 }
  0x36   : > { %345 = vst.msk [vmem:[#allocation2 + $0xd8] sm:$0xff] %vm317_vm0, %v2108_v32 }
  0x37   : > { %773 = vmatpush.bf16.msra.mxu0 %v1930_v7  ;;  %1959 = vmatpush.bf16.msra.mxu1 %v1930_v7  ;;  %346 = vst.msk [vmem:[#allocation2 + $0xe0] sm:$0xff] %vm317_vm0, %v2108_v32 }
  0x38   : > { %1960 = vmatpush.bf16.msra.mxu2 %v1930_v7  ;;  %1961 = vmatpush.bf16.msra.mxu3 %v1930_v7  ;;  %347 = vst.msk [vmem:[#allocation2 + $0xe8] sm:$0xff] %vm317_vm0, %v2108_v32 }
  0x39   : > { %348 = vst.msk [vmem:[#allocation2 + $0xf0] sm:$0xff] %vm317_vm0, %v2108_v32 }
  0x3a   : > { %774 = vmatmul.bf16.vlgmr.msra.gmra.mxu0 %v1898_v8  ;;  %814 = vmatmul.bf16.vlgmr.msra.gmra.mxu1 %v1906_v9  ;;  %349 = vst.msk [vmem:[#allocation2 + $0xf8] sm:$0xff] %vm317_vm0, %v2108_v32  ;;  %v384_v9 = vld [vmem:[#allocation2 + $0x10] sm:$0xff] }
  0x3b   : > { %854 = vmatmul.bf16.vlgmr.msra.gmra.mxu2 %v1914_v10  ;;  %894 = vmatmul.bf16.vlgmr.msra.gmra.mxu3 %v1922_v11  ;;  %350 = vst.msk [vmem:[#allocation2 + $0x100] sm:$0xff] %vm317_vm0, %v2108_v32 }
  0x3c   : > { %351 = vst.msk [vmem:[#allocation2 + $0x108] sm:$0xff] %vm317_vm0, %v2108_v32 }
  0x3d   : > { %352 = vst.msk [vmem:[#allocation2 + $0x110] sm:$0xff] %vm317_vm0, %v2108_v32 }
  0x3e   : > { %353 = vst.msk [vmem:[#allocation2 + $0x118] sm:$0xff] %vm317_vm0, %v2108_v32 }
  0x3f   : > { %354 = vst.msk [vmem:[#allocation2 + $0x120] sm:$0xff] %vm317_vm0, %v2108_v32 }
  0x40   : > { %355 = vst.msk [vmem:[#allocation2 + $0x128] sm:$0xff] %vm317_vm0, %v2108_v32 }
  0x41   : > { %356 = vst.msk [vmem:[#allocation2 + $0x130] sm:$0xff] %vm317_vm0, %v2108_v32 }
  0x42   : > { %357 = vst.msk [vmem:[#allocation2 + $0x138] sm:$0xff] %vm317_vm0, %v2108_v32  ;;  %v414_v61 = vld [vmem:[#allocation2 + $0x100] sm:$0xff] }
  0x43   : > { %358 = vst.msk [vmem:[#allocation2 + $0x140] sm:$0xff] %vm317_vm0, %v2108_v32  ;;  %v415_v5 = vld [vmem:[#allocation2 + $0x108] sm:$0xff] }
  0x44   : > { %359 = vst.msk [vmem:[#allocation2 + $0x148] sm:$0xff] %vm317_vm0, %v2108_v32 }
  0x45   : > { %360 = vst.msk [vmem:[#allocation2 + $0x150] sm:$0xff] %vm317_vm0, %v2108_v32 }
  0x46   : > { %361 = vst.msk [vmem:[#allocation2 + $0x158] sm:$0xff] %vm317_vm0, %v2108_v32 }
  0x47   : > { %362 = vst.msk [vmem:[#allocation2 + $0x160] sm:$0xff] %vm317_vm0, %v2108_v32 }
  0x48   : > { %363 = vst.msk [vmem:[#allocation2 + $0x168] sm:$0xff] %vm317_vm0, %v2108_v32 }
  0x49   : > { %364 = vst.msk [vmem:[#allocation2 + $0x170] sm:$0xff] %vm317_vm0, %v2108_v32 }
  0x4a   : > { %779 = vmatmul.bf16.gmra.mxu0 %v1899_v12  ;;  %819 = vmatmul.bf16.gmra.mxu1 %v1907_v13  ;;  %365 = vst.msk [vmem:[#allocation2 + $0x178] sm:$0xff] %vm317_vm0, %v2108_v32  ;;  %v400_v13 = vld [vmem:[#allocation2 + $0x90] sm:$0xff] }
  0x4b   : > { %859 = vmatmul.bf16.gmra.mxu2 %v1915_v14  ;;  %899 = vmatmul.bf16.gmra.mxu3 %v1923_v15  ;;  %366 = vst.msk [vmem:[#allocation2 + $0x180] sm:$0xff] %vm317_vm0, %v2108_v32 }
  0x4c   : > { %367 = vst.msk [vmem:[#allocation2 + $0x188] sm:$0xff] %vm317_vm0, %v2108_v32 }
  0x4d   : > { %368 = vst.msk [vmem:[#allocation2 + $0x190] sm:$0xff] %vm317_vm0, %v2108_v32 }
  0x4e   : > { %369 = vst.msk [vmem:[#allocation2 + $0x198] sm:$0xff] %vm317_vm0, %v2108_v32 }
  0x4f   : > { %370 = vst.msk [vmem:[#allocation2 + $0x1a0] sm:$0xff] %vm317_vm0, %v2108_v32 }
  0x50   : > { %371 = vst.msk [vmem:[#allocation2 + $0x1a8] sm:$0xff] %vm317_vm0, %v2108_v32 }
  0x51   : > { %372 = vst.msk [vmem:[#allocation2 + $0x1b0] sm:$0xff] %vm317_vm0, %v2108_v32 }
  0x52   : > { %373 = vst.msk [vmem:[#allocation2 + $0x1b8] sm:$0xff] %vm317_vm0, %v2108_v32  ;;  %v430_v63 = vld [vmem:[#allocation2 + $0x180] sm:$0xff] }
  0x53   : > { %374 = vst.msk [vmem:[#allocation2 + $0x1c0] sm:$0xff] %vm317_vm0, %v2108_v32  ;;  %v431_v7 = vld [vmem:[#allocation2 + $0x188] sm:$0xff] }
  0x54   : > { %375 = vst.msk [vmem:[#allocation2 + $0x1c8] sm:$0xff] %vm317_vm0, %v2108_v32 }
  0x55   : > { %376 = vst.msk [vmem:[#allocation2 + $0x1d0] sm:$0xff] %vm317_vm0, %v2108_v32 }
  0x56   : > { %377 = vst.msk [vmem:[#allocation2 + $0x1d8] sm:$0xff] %vm317_vm0, %v2108_v32 }
  0x57   : > { %378 = vst.msk [vmem:[#allocation2 + $0x1e0] sm:$0xff] %vm317_vm0, %v2108_v32 }
  0x58   : > { %379 = vst.msk [vmem:[#allocation2 + $0x1e8] sm:$0xff] %vm317_vm0, %v2108_v32 }
  0x59   : > { %380 = vst.msk [vmem:[#allocation2 + $0x1f0] sm:$0xff] %vm317_vm0, %v2108_v32 }
  0x5a   : > { %784 = vmatmul.bf16.gmra.mxu0 %v1900_v16  ;;  %824 = vmatmul.bf16.gmra.mxu1 %v1908_v17  ;;  %381 = vst.msk [vmem:[#allocation2 + $0x1f8] sm:$0xff] %vm317_vm0, %v2108_v32  ;;  %v416_v17 = vld [vmem:[#allocation2 + $0x110] sm:$0xff] }
  0x5b   : > { %864 = vmatmul.bf16.gmra.mxu2 %v1916_v18  ;;  %904 = vmatmul.bf16.gmra.mxu3 %v1924_v19  ;;  %v432_v19 = vld [vmem:[#allocation2 + $0x190] sm:$0xff] }
  0x6a   : > { %789 = vmatmul.bf16.gmra.mxu0 %v1901_v20  ;;  %829 = vmatmul.bf16.gmra.mxu1 %v1909_v21  ;;  %v385_v21 = vld [vmem:[#allocation2 + $0x18] sm:$0xff] }
  0x6b   : > { %869 = vmatmul.bf16.gmra.mxu2 %v1917_v22  ;;  %909 = vmatmul.bf16.gmra.mxu3 %v1925_v23  ;;  %v401_v23 = vld [vmem:[#allocation2 + $0x98] sm:$0xff] }
  0x7a   : > { %794 = vmatmul.bf16.gmra.mxu0 %v1902_v24  ;;  %834 = vmatmul.bf16.gmra.mxu1 %v1910_v25  ;;  %v417_v25 = vld [vmem:[#allocation2 + $0x118] sm:$0xff] }
  0x7b   : > { %874 = vmatmul.bf16.gmra.mxu2 %v1918_v26  ;;  %914 = vmatmul.bf16.gmra.mxu3 %v1926_v27 }
  0x8a   : > { %799 = vmatmul.bf16.gmra.mxu0 %v1903_v28  ;;  %839 = vmatmul.bf16.gmra.mxu1 %v1911_v29  ;;  %v433_v28 = vld [vmem:[#allocation2 + $0x198] sm:$0xff] }
  0x8b   : > { %879 = vmatmul.bf16.gmra.mxu2 %v1919_v30  ;;  %919 = vmatmul.bf16.gmra.mxu3 %v1927_v31 }
  0x9a   : > { %804 = vmatmul.bf16.gmra.mxu0 %v1904_v33  ;;  %844 = vmatmul.bf16.gmra.mxu1 %v1912_v34  ;;  %v386_v34 = vld [vmem:[#allocation2 + $0x20] sm:$0xff] }
  0x9b   : > { %884 = vmatmul.bf16.gmra.mxu2 %v1920_v35  ;;  %924 = vmatmul.bf16.gmra.mxu3 %v1928_v36  ;;  %v402_v35 = vld [vmem:[#allocation2 + $0xa0] sm:$0xff] }
  0xaa   : > { %809 = vmatmul.bf16.gmra.mxu0 %v1905_v37  ;;  %849 = vmatmul.bf16.gmra.mxu1 %v1913_v38 }
  0xab   : > { %889 = vmatmul.bf16.gmra.mxu2 %v1921_v39  ;;  %929 = vmatmul.bf16.gmra.mxu3 %v1929_v40 }
  0xb7   : > { %v775_v42 = vpop.f32.mrf.mxu0  ;;  %v815_v43 = vpop.f32.mrf.mxu1 }
  0xb8   : > { %v935_v44 = vadd.f32 %v775_v42, %v382_v41  ;;  %v951_v0 = vadd.f32 %v815_v43, %v398_v57 }
  0xba   : > { %1000 = vst.msk [vmem:[#allocation2] sm:$0xff] %vm317_vm0, %v935_v44 }
  0xbb   : > { %1016 = vst.msk [vmem:[#allocation2 + $0x80] sm:$0xff] %vm317_vm0, %v951_v0 }
  0xbe   : > { %v855_v46 = vpop.f32.mrf.mxu2  ;;  %v895_v47 = vpop.f32.mrf.mxu3 }
  0xbf   : > { %v777_v48 = vpop.f32.mrf.mxu0  ;;  %v817_v49 = vpop.f32.mrf.mxu1  ;;  %v967_v2 = vadd.f32 %v855_v46, %v414_v61  ;;  %v983_v4 = vadd.f32 %v895_v47, %v430_v63 }
  0xc0   : > { %v936_v6 = vadd.f32 %v777_v48, %v383_v1  ;;  %v952_v8 = vadd.f32 %v817_v49, %v399_v3 }
  0xc1   : > { %v1067_v51 = vld [vmem:[#allocation2] sm:$0xff]  ;;  %1032 = vst.msk [vmem:[#allocation2 + $0x100] sm:$0xff] %vm317_vm0, %v967_v2 }
  0xc2   : > { %v1135_v52 = vmul.f32 %v2360_v45, %v1067_v51  ;;  %1048 = vst.msk [vmem:[#allocation2 + $0x180] sm:$0xff] %vm317_vm0, %v983_v4  ;;  %v1083_v26 = vld [vmem:[#allocation2 + $0x80] sm:$0xff] }
  0xc3   : > { %1001 = vst.msk [vmem:[#allocation2 + $0x8] sm:$0xff] %vm317_vm0, %v936_v6  ;;  %v1151_v29 = vmul.f32 %v2360_v45, %v1083_v26 }
  0xc4   : > { %v1203_v53 = vadd.f32 %v2369_v50, %v1135_v52  ;;  %1017 = vst.msk [vmem:[#allocation2 + $0x88] sm:$0xff] %vm317_vm0, %v952_v8 }
  0xc5   : > { %v1219_v41 = vadd.f32 %v2369_v50, %v1151_v29 }
  0xc6   : > { %vm1267_vm1 = vcmp.gt.f32.partialorder %v1203_v53, 0.0  ;;  %v1331_v54 = vmul.f32 0.1, %v1203_v53  ;;  %v857_v55 = vpop.f32.mrf.mxu2  ;;  %v897_v56 = vpop.f32.mrf.mxu3 }
  0xc7   : > { %v780_v58 = vpop.f32.mrf.mxu0  ;;  %v820_v59 = vpop.f32.mrf.mxu1  ;;  %v968_v12 = vadd.f32 %v857_v55, %v415_v5  ;;  %v984_v16 = vadd.f32 %v897_v56, %v431_v7  ;;  %vm1283_vm3 = vcmp.gt.f32.partialorder %v1219_v41, 0.0  ;;  %v1347_v52 = vmul.f32 0.1, %v1219_v41 }
  0xc8   : > { %v1395_v60 = vsel %vm1267_vm1, %v1203_v53, %v1331_v54  ;;  %v937_v18 = vadd.f32 %v780_v58, %v384_v9  ;;  %v953_v20 = vadd.f32 %v820_v59, %v400_v13  ;;  %v1099_v30 = vld [vmem:[#allocation2 + $0x100] sm:$0xff] }
  0xc9   : > { %v1459_v62 = vpack.c.bf16 %v1395_v60, %v1395_v60  ;;  %1033 = vst.msk [vmem:[#allocation2 + $0x108] sm:$0xff] %vm317_vm0, %v968_v12  ;;  %v1167_v36 = vmul.f32 %v2360_v45, %v1099_v30  ;;  %v1115_v37 = vld [vmem:[#allocation2 + $0x180] sm:$0xff]  ;;  %v1411_v59 = vsel %vm1283_vm3, %v1219_v41, %v1347_v52 }
  0xca   : > { %1049 = vst.msk [vmem:[#allocation2 + $0x188] sm:$0xff] %vm317_vm0, %v984_v16  ;;  %v1183_v42 = vmul.f32 %v2360_v45, %v1115_v37  ;;  %v1068_v43 = vld [vmem:[#allocation2 + $0x8] sm:$0xff]  ;;  %v1475_v63 = vpack.c.bf16 %v1411_v59, %v1411_v59 }
  0xcb   : > { %1524 = vst.msk [vmem:[%s2392_s30] sm:$0xf] %vm1523_vm2, %v1459_v62  ;;  %v1235_v46 = vadd.f32 %v2369_v50, %v1167_v36  ;;  %v1136_v47 = vmul.f32 %v2360_v45, %v1068_v43  ;;  %v1084_v48 = vld [vmem:[#allocation2 + $0x88] sm:$0xff] }
  0xcc   : > { %1002 = vst.msk [vmem:[#allocation2 + $0x10] sm:$0xff] %vm317_vm0, %v937_v18  ;;  %v1251_v53 = vadd.f32 %v2369_v50, %v1183_v42  ;;  %v1152_v54 = vmul.f32 %v2360_v45, %v1084_v48 }
  0xcd   : > { %1018 = vst.msk [vmem:[#allocation2 + $0x90] sm:$0xff] %vm317_vm0, %v953_v20  ;;  %vm1299_vm4 = vcmp.gt.f32.partialorder %v1235_v46, 0.0  ;;  %v1363_v56 = vmul.f32 0.1, %v1235_v46  ;;  %v1204_v57 = vadd.f32 %v2369_v50, %v1136_v47 }
  0xce   : > { %v860_v10 = vpop.f32.mrf.mxu2  ;;  %v900_v11 = vpop.f32.mrf.mxu3  ;;  %vm1315_vm5 = vcmp.gt.f32.partialorder %v1251_v53, 0.0  ;;  %v1379_v60 = vmul.f32 0.1, %v1251_v53  ;;  %v1220_v61 = vadd.f32 %v2369_v50, %v1152_v54  ;;  %1540 = vst.msk [vmem:[%s2392_s30 + $0x40] sm:$0xf] %vm1523_vm2, %v1475_v63 }
  0xcf   : > { %v782_v14 = vpop.f32.mrf.mxu0  ;;  %v822_v15 = vpop.f32.mrf.mxu1  ;;  %v969_v22 = vadd.f32 %v860_v10, %v416_v17  ;;  %v985_v24 = vadd.f32 %v900_v11, %v432_v19  ;;  %v1427_v0 = vsel %vm1299_vm4, %v1235_v46, %v1363_v56  ;;  %vm1268_vm6 = vcmp.gt.f32.partialorder %v1204_v57, 0.0 }
  0xd0   : > { %v938_v27 = vadd.f32 %v782_v14, %v385_v21  ;;  %v954_v31 = vadd.f32 %v822_v15, %v401_v23  ;;  %v1100_v55 = vld [vmem:[#allocation2 + $0x108] sm:$0xff]  ;;  %v1332_v1 = vmul.f32 0.1, %v1204_v57  ;;  %v1491_v4 = vpack.c.bf16 %v1427_v0, %v1427_v0 }
  0xd1   : > { %1034 = vst.msk [vmem:[#allocation2 + $0x110] sm:$0xff] %vm317_vm0, %v969_v22  ;;  %v1168_v58 = vmul.f32 %v2360_v45, %v1100_v55  ;;  %v1116_v62 = vld [vmem:[#allocation2 + $0x188] sm:$0xff]  ;;  %v1443_v5 = vsel %vm1315_vm5, %v1251_v53, %v1379_v60  ;;  %vm1284_vm7 = vcmp.gt.f32.partialorder %v1220_v61, 0.0  ;;  %v1348_v6 = vmul.f32 0.1, %v1220_v61 }
  0xd2   : > { %1050 = vst.msk [vmem:[#allocation2 + $0x190] sm:$0xff] %vm317_vm0, %v985_v24  ;;  %v1507_v9 = vpack.c.bf16 %v1443_v5, %v1443_v5  ;;  %v1396_v10 = vsel %vm1268_vm6, %v1204_v57, %v1332_v1  ;;  %v1184_v12 = vmul.f32 %v2360_v45, %v1116_v62 }
  0xd3   : > { %1003 = vst.msk [vmem:[#allocation2 + $0x18] sm:$0xff] %vm317_vm0, %v938_v27  ;;  %v1069_v2 = vld [vmem:[#allocation2 + $0x10] sm:$0xff]  ;;  %v1236_v11 = vadd.f32 %v2369_v50, %v1168_v58  ;;  %v1460_v17 = vpack.c.bf16 %v1396_v10, %v1396_v10  ;;  %v1412_v18 = vsel %vm1284_vm7, %v1220_v61, %v1348_v6 }
  0xd4   : > { %1019 = vst.msk [vmem:[#allocation2 + $0x98] sm:$0xff] %vm317_vm0, %v954_v31  ;;  %v1085_v3 = vld [vmem:[#allocation2 + $0x90] sm:$0xff]  ;;  %v1137_v19 = vmul.f32 %v2360_v45, %v1069_v2  ;;  %v1476_v22 = vpack.c.bf16 %v1412_v18, %v1412_v18  ;;  %v1252_v24 = vadd.f32 %v2369_v50, %v1184_v12  ;;  %v418_v2 = vld [vmem:[#allocation2 + $0x120] sm:$0xff] }
  0xd5   : > { %1556 = vst.msk [vmem:[%s2392_s30 + $0x80] sm:$0xf] %vm1523_vm2, %v1491_v4  ;;  %v1153_v20 = vmul.f32 %v2360_v45, %v1085_v3  ;;  %vm1300_vm8 = vcmp.gt.f32.partialorder %v1236_v11, 0.0  ;;  %v1364_v23 = vmul.f32 0.1, %v1236_v11  ;;  %v434_v3 = vld [vmem:[#allocation2 + $0x1a0] sm:$0xff] }
  0xd6   : > { %v862_v32 = vpop.f32.mrf.mxu2  ;;  %v902_v33 = vpop.f32.mrf.mxu3  ;;  %1572 = vst.msk [vmem:[%s2392_s30 + $0xc0] sm:$0xf] %vm1523_vm2, %v1507_v9  ;;  %vm1316_vm9 = vcmp.gt.f32.partialorder %v1252_v24, 0.0  ;;  %v1380_v30 = vmul.f32 0.1, %v1252_v24 }
  0xd7   : > { %v970_v38 = vadd.f32 %v862_v32, %v417_v25  ;;  %v785_v39 = vpop.f32.mrf.mxu0  ;;  %v825_v40 = vpop.f32.mrf.mxu1  ;;  %v986_v44 = vadd.f32 %v902_v33, %v433_v28  ;;  %1525 = vst.msk [vmem:[%s2392_s30 + $0x4] sm:$0xf] %vm1523_vm2, %v1460_v17  ;;  %v1205_v25 = vadd.f32 %v2369_v50, %v1137_v19  ;;  %v1221_v26 = vadd.f32 %v2369_v50, %v1153_v20  ;;  %v387_v19 = vld [vmem:[#allocation2 + $0x28] sm:$0xff] }
  0xd8   : > { %v939_v49 = vadd.f32 %v785_v39, %v386_v34  ;;  %v955_v51 = vadd.f32 %v825_v40, %v402_v35  ;;  %v1101_v13 = vld [vmem:[#allocation2 + $0x110] sm:$0xff]  ;;  %1541 = vst.msk [vmem:[%s2392_s30 + $0x44] sm:$0xf] %vm1523_vm2, %v1476_v22  ;;  %v1428_v29 = vsel %vm1300_vm8, %v1236_v11, %v1364_v23  ;;  %v1444_v35 = vsel %vm1316_vm9, %v1252_v24, %v1380_v30  ;;  %v403_v20 = vld [vmem:[#allocation2 + $0xa8] sm:$0xff] }
  0xd9   : > { %1035 = vst.msk [vmem:[#allocation2 + $0x118] sm:$0xff] %vm317_vm0, %v970_v38  ;;  %v1117_v14 = vld [vmem:[#allocation2 + $0x190] sm:$0xff]  ;;  %v1169_v27 = vmul.f32 %v2360_v45, %v1101_v13  ;;  %v1492_v33 = vpack.c.bf16 %v1428_v29, %v1428_v29  ;;  %vm1269_vm10 = vcmp.gt.f32.partialorder %v1205_v25, 0.0  ;;  %v1333_v34 = vmul.f32 0.1, %v1205_v25 }
  0xda   : > { %1051 = vst.msk [vmem:[#allocation2 + $0x198] sm:$0xff] %vm317_vm0, %v986_v44  ;;  %v1070_v21 = vld [vmem:[#allocation2 + $0x18] sm:$0xff]  ;;  %v1185_v28 = vmul.f32 %v2360_v45, %v1117_v14  ;;  %vm1285_vm11 = vcmp.gt.f32.partialorder %v1221_v26, 0.0  ;;  %v1349_v36 = vmul.f32 0.1, %v1221_v26  ;;  %v1508_v39 = vpack.c.bf16 %v1444_v35, %v1444_v35 }
  0xdb   : > { %1004 = vst.msk [vmem:[#allocation2 + $0x20] sm:$0xff] %vm317_vm0, %v939_v49  ;;  %v1138_v31 = vmul.f32 %v2360_v45, %v1070_v21  ;;  %v1086_v32 = vld [vmem:[#allocation2 + $0x98] sm:$0xff]  ;;  %v1237_v37 = vadd.f32 %v2369_v50, %v1169_v27  ;;  %v1397_v40 = vsel %vm1269_vm10, %v1205_v25, %v1333_v34 }
  0xdc   : > { %1020 = vst.msk [vmem:[#allocation2 + $0xa0] sm:$0xff] %vm317_vm0, %v955_v51  ;;  %v1253_v38 = vadd.f32 %v2369_v50, %v1185_v28  ;;  %v1154_v42 = vmul.f32 %v2360_v45, %v1086_v32  ;;  %v1461_v47 = vpack.c.bf16 %v1397_v40, %v1397_v40  ;;  %v1413_v48 = vsel %vm1285_vm11, %v1221_v26, %v1349_v36 }
  0xdd   : > { %1557 = vst.msk [vmem:[%s2392_s30 + $0x84] sm:$0xf] %vm1523_vm2, %v1492_v33  ;;  %v1206_v41 = vadd.f32 %v2369_v50, %v1138_v31  ;;  %vm1301_vm12 = vcmp.gt.f32.partialorder %v1237_v37, 0.0  ;;  %v1365_v49 = vmul.f32 0.1, %v1237_v37  ;;  %v1477_v55 = vpack.c.bf16 %v1413_v48, %v1413_v48  ;;  %v419_v33 = vld [vmem:[#allocation2 + $0x128] sm:$0xff] }
  0xde   : > { %v2434_v7 = vpop.f32.mrf.mxu2  ;;  %v2436_v8 = vpop.f32.mrf.mxu3  ;;  %1573 = vst.msk [vmem:[%s2392_s30 + $0xc4] sm:$0xf] %vm1523_vm2, %v1508_v39  ;;  %vm1317_vm13 = vcmp.gt.f32.partialorder %v1253_v38, 0.0  ;;  %v1381_v56 = vmul.f32 0.1, %v1253_v38  ;;  %v1222_v59 = vadd.f32 %v2369_v50, %v1154_v42 }
  0xdf   : > { %v2442_v15 = vpop.f32.mrf.mxu0  ;;  %v2444_v16 = vpop.f32.mrf.mxu1  ;;  %vm1270_vm14 = vcmp.gt.f32.partialorder %v1206_v41, 0.0  ;;  %1526 = vst.msk [vmem:[%s2392_s30 + $0x8] sm:$0xf] %vm1523_vm2, %v1461_v47  ;;  %v1429_v57 = vsel %vm1301_vm12, %v1237_v37, %v1365_v49  ;;  %v1334_v58 = vmul.f32 0.1, %v1206_v41  ;;  %v971_v17 = vadd.f32 %v2434_v7, %v418_v2  ;;  %v420_v47 = vld [vmem:[#allocation2 + $0x130] sm:$0xff] }
  0xe0   : > { %v1102_v43 = vld [vmem:[#allocation2 + $0x118] sm:$0xff]  ;;  %1542 = vst.msk [vmem:[%s2392_s30 + $0x48] sm:$0xf] %vm1523_vm2, %v1477_v55  ;;  %v1493_v61 = vpack.c.bf16 %v1429_v57, %v1429_v57  ;;  %v1445_v62 = vsel %vm1317_vm13, %v1253_v38, %v1381_v56  ;;  %vm1286_vm15 = vcmp.gt.f32.partialorder %v1222_v59, 0.0  ;;  %v1350_v6 = vmul.f32 0.1, %v1222_v59 }
  0xe1   : > { %v1118_v51 = vld [vmem:[#allocation2 + $0x198] sm:$0xff]  ;;  %v1170_v60 = vmul.f32 %v2360_v45, %v1102_v43  ;;  %v1509_v4 = vpack.c.bf16 %v1445_v62, %v1445_v62  ;;  %v1398_v5 = vsel %vm1270_vm14, %v1206_v41, %v1334_v58  ;;  %v987_v18 = vadd.f32 %v2436_v8, %v434_v3  ;;  %1036 = vst.msk [vmem:[#allocation2 + $0x120] sm:$0xff] %vm317_vm0, %v971_v17  ;;  %v435_v38 = vld [vmem:[#allocation2 + $0x1a8] sm:$0xff]  ;;  %v404_v41 = vld [vmem:[#allocation2 + $0xb0] sm:$0xff] }
  0xe2   : > { %v1071_v52 = vld [vmem:[#allocation2 + $0x20] sm:$0xff]  ;;  %v1186_v63 = vmul.f32 %v2360_v45, %v1118_v51  ;;  %1558 = vst.msk [vmem:[%s2392_s30 + $0x88] sm:$0xf] %vm1523_vm2, %v1493_v61  ;;  %v1462_v9 = vpack.c.bf16 %v1398_v5, %v1398_v5  ;;  %v1414_v13 = vsel %vm1286_vm15, %v1222_v59, %v1350_v6  ;;  %v940_v29 = vadd.f32 %v2442_v15, %v387_v19  ;;  %v388_v15 = vld [vmem:[#allocation2 + $0x30] sm:$0xff]  ;;  %v389_v56 = vld [vmem:[#allocation2 + $0x38] sm:$0xff] }
  0xe3   : > { %v1139_v0 = vmul.f32 %v2360_v45, %v1071_v52  ;;  %v1087_v1 = vld [vmem:[#allocation2 + $0xa0] sm:$0xff]  ;;  %v1238_v10 = vadd.f32 %v2369_v50, %v1170_v60  ;;  %1574 = vst.msk [vmem:[%s2392_s30 + $0xc8] sm:$0xf] %vm1523_vm2, %v1509_v4  ;;  %v1478_v21 = vpack.c.bf16 %v1414_v13, %v1414_v13  ;;  %v956_v37 = vadd.f32 %v2444_v16, %v403_v20  ;;  %v436_v49 = vld [vmem:[#allocation2 + $0x1b0] sm:$0xff]  ;;  %v405_v60 = vld [vmem:[#allocation2 + $0xb8] sm:$0xff] }
  0xe4   : > { %v1254_v11 = vadd.f32 %v2369_v50, %v1186_v63  ;;  %v1155_v14 = vmul.f32 %v2360_v45, %v1087_v1  ;;  %1527 = vst.msk [vmem:[%s2392_s30 + $0xc] sm:$0xf] %vm1523_vm2, %v1462_v9  ;;  %v421_v1 = vld [vmem:[#allocation2 + $0x138] sm:$0xff]  ;;  %v390_v9 = vld [vmem:[#allocation2 + $0x40] sm:$0xff] }
  0xe5   : > { %v1207_v12 = vadd.f32 %v2369_v50, %v1139_v0  ;;  %vm1302_vm1 = vcmp.gt.f32.partialorder %v1238_v10, 0.0  ;;  %v1366_v22 = vmul.f32 0.1, %v1238_v10  ;;  %1543 = vst.msk [vmem:[%s2392_s30 + $0x4c] sm:$0xf] %vm1523_vm2, %v1478_v21  ;;  %v437_v6 = vld [vmem:[#allocation2 + $0x1b8] sm:$0xff] }
  0xe6   : > { %v2469_v44 = vpop.f32.mrf.mxu2  ;;  %v2471_v46 = vpop.f32.mrf.mxu3  ;;  %vm1318_vm3 = vcmp.gt.f32.partialorder %v1254_v11, 0.0  ;;  %v1382_v25 = vmul.f32 0.1, %v1254_v11  ;;  %v1223_v27 = vadd.f32 %v2369_v50, %v1155_v14  ;;  %1052 = vst.msk [vmem:[#allocation2 + $0x1a0] sm:$0xff] %vm317_vm0, %v987_v18  ;;  %v422_v20 = vld [vmem:[#allocation2 + $0x140] sm:$0xff] }
  0xe7   : > { %v2473_v53 = vpop.f32.mrf.mxu0  ;;  %v2475_v54 = vpop.f32.mrf.mxu1  ;;  %vm1271_vm4 = vcmp.gt.f32.partialorder %v1207_v12, 0.0  ;;  %v1335_v26 = vmul.f32 0.1, %v1207_v12  ;;  %v1430_v28 = vsel %vm1302_vm1, %v1238_v10, %v1366_v22  ;;  %1005 = vst.msk [vmem:[#allocation2 + $0x28] sm:$0xff] %vm317_vm0, %v940_v29  ;;  %v972_v40 = vadd.f32 %v2469_v44, %v419_v33  ;;  %v406_v10 = vld [vmem:[#allocation2 + $0xc0] sm:$0xff] }
  0xe8   : > { %v1494_v30 = vpack.c.bf16 %v1430_v28, %v1430_v28  ;;  %v1446_v31 = vsel %vm1318_vm3, %v1254_v11, %v1382_v25  ;;  %vm1287_vm5 = vcmp.gt.f32.partialorder %v1223_v27, 0.0  ;;  %v1351_v36 = vmul.f32 0.1, %v1223_v27  ;;  %v1103_v48 = vld [vmem:[#allocation2 + $0x120] sm:$0xff]  ;;  %1021 = vst.msk [vmem:[#allocation2 + $0xa8] sm:$0xff] %vm317_vm0, %v956_v37 }
  0xe9   : > { %v1399_v32 = vsel %vm1271_vm4, %v1207_v12, %v1335_v26  ;;  %v1510_v34 = vpack.c.bf16 %v1446_v31, %v1446_v31  ;;  %v988_v43 = vadd.f32 %v2471_v46, %v435_v38  ;;  %v941_v16 = vadd.f32 %v2473_v53, %v388_v15  ;;  %1037 = vst.msk [vmem:[#allocation2 + $0x128] sm:$0xff] %vm317_vm0, %v972_v40  ;;  %v438_v22 = vld [vmem:[#allocation2 + $0x1c0] sm:$0xff] }
  0xea   : > { %v1463_v35 = vpack.c.bf16 %v1399_v32, %v1399_v32  ;;  %1559 = vst.msk [vmem:[%s2392_s30 + $0x8c] sm:$0xf] %vm1523_vm2, %v1494_v30  ;;  %v1415_v39 = vsel %vm1287_vm5, %v1223_v27, %v1351_v36  ;;  %v1171_v55 = vmul.f32 %v2360_v45, %v1103_v48  ;;  %v957_v44 = vadd.f32 %v2475_v54, %v404_v41 }
  0xeb   : > { %1575 = vst.msk [vmem:[%s2392_s30 + $0xcc] sm:$0xf] %vm1523_vm2, %v1510_v34  ;;  %v1479_v42 = vpack.c.bf16 %v1415_v39, %v1415_v39  ;;  %v391_v34 = vld [vmem:[#allocation2 + $0x48] sm:$0xff] }
  0xec   : > { %1528 = vst.msk [vmem:[%s2392_s30 + $0x10] sm:$0xf] %vm1523_vm2, %v1463_v35  ;;  %v1239_v61 = vadd.f32 %v2369_v50, %v1171_v55  ;;  %v407_v35 = vld [vmem:[#allocation2 + $0xc8] sm:$0xff] }
  0xed   : > { %1544 = vst.msk [vmem:[%s2392_s30 + $0x50] sm:$0xf] %vm1523_vm2, %v1479_v42  ;;  %v1119_v59 = vld [vmem:[#allocation2 + $0x1a0] sm:$0xff] }
  0xee   : > { %v870_v23 = vpop.f32.mrf.mxu2  ;;  %v910_v24 = vpop.f32.mrf.mxu3  ;;  %v1187_v53 = vmul.f32 %v2360_v45, %v1119_v59  ;;  %v1072_v62 = vld [vmem:[#allocation2 + $0x28] sm:$0xff]  ;;  %1053 = vst.msk [vmem:[#allocation2 + $0x1a8] sm:$0xff] %vm317_vm0, %v988_v43  ;;  %vm1303_vm6 = vcmp.gt.f32.partialorder %v1239_v61, 0.0  ;;  %v1367_v2 = vmul.f32 0.1, %v1239_v61 }
  0xef   : > { %v792_v7 = vpop.f32.mrf.mxu0  ;;  %v832_v8 = vpop.f32.mrf.mxu1  ;;  %v973_v46 = vadd.f32 %v870_v23, %v420_v47  ;;  %v989_v63 = vadd.f32 %v910_v24, %v436_v49  ;;  %v1140_v0 = vmul.f32 %v2360_v45, %v1072_v62  ;;  %1006 = vst.msk [vmem:[#allocation2 + $0x30] sm:$0xff] %vm317_vm0, %v941_v16  ;;  %v1088_v13 = vld [vmem:[#allocation2 + $0xa8] sm:$0xff] }
  0xf0   : > { %v942_v54 = vadd.f32 %v792_v7, %v389_v56  ;;  %v1255_v3 = vadd.f32 %v2369_v50, %v1187_v53  ;;  %1022 = vst.msk [vmem:[#allocation2 + $0xb0] sm:$0xff] %vm317_vm0, %v957_v44  ;;  %v958_v4 = vadd.f32 %v832_v8, %v405_v60  ;;  %v1431_v11 = vsel %vm1303_vm6, %v1239_v61, %v1367_v2  ;;  %v1104_v25 = vld [vmem:[#allocation2 + $0x128] sm:$0xff] }
  0xf1   : > { %v1208_v5 = vadd.f32 %v2369_v50, %v1140_v0  ;;  %1038 = vst.msk [vmem:[#allocation2 + $0x130] sm:$0xff] %vm317_vm0, %v973_v46  ;;  %v1495_v17 = vpack.c.bf16 %v1431_v11, %v1431_v11  ;;  %v1156_v19 = vmul.f32 %v2360_v45, %v1088_v13  ;;  %v1172_v32 = vmul.f32 %v2360_v45, %v1104_v25  ;;  %v423_v11 = vld [vmem:[#allocation2 + $0x148] sm:$0xff] }
  0xf2   : > { %vm1319_vm7 = vcmp.gt.f32.partialorder %v1255_v3, 0.0  ;;  %v1383_v12 = vmul.f32 0.1, %v1255_v3  ;;  %1054 = vst.msk [vmem:[#allocation2 + $0x1b0] sm:$0xff] %vm317_vm0, %v989_v63 }
  0xf3   : > { %vm1272_vm8 = vcmp.gt.f32.partialorder %v1208_v5, 0.0  ;;  %v1336_v18 = vmul.f32 0.1, %v1208_v5  ;;  %1007 = vst.msk [vmem:[#allocation2 + $0x38] sm:$0xff] %vm317_vm0, %v942_v54  ;;  %v1224_v31 = vadd.f32 %v2369_v50, %v1156_v19  ;;  %v1240_v41 = vadd.f32 %v2369_v50, %v1172_v32 }
  0xf4   : > { %v1447_v24 = vsel %vm1319_vm7, %v1255_v3, %v1383_v12  ;;  %1023 = vst.msk [vmem:[#allocation2 + $0xb8] sm:$0xff] %vm317_vm0, %v958_v4 }
  0xf5   : > { %1560 = vst.msk [vmem:[%s2392_s30 + $0x90] sm:$0xf] %vm1523_vm2, %v1495_v17  ;;  %v1511_v29 = vpack.c.bf16 %v1447_v24, %v1447_v24  ;;  %v1400_v30 = vsel %vm1272_vm8, %v1208_v5, %v1336_v18  ;;  %v1120_v33 = vld [vmem:[#allocation2 + $0x1a8] sm:$0xff]  ;;  %vm1288_vm9 = vcmp.gt.f32.partialorder %v1224_v31, 0.0  ;;  %v1352_v40 = vmul.f32 0.1, %v1224_v31 }
  0xf6   : > { %v872_v51 = vpop.f32.mrf.mxu2  ;;  %v912_v52 = vpop.f32.mrf.mxu3  ;;  %v1464_v36 = vpack.c.bf16 %v1400_v30, %v1400_v30  ;;  %v1188_v37 = vmul.f32 %v2360_v45, %v1120_v33  ;;  %v1073_v38 = vld [vmem:[#allocation2 + $0x30] sm:$0xff]  ;;  %vm1304_vm10 = vcmp.gt.f32.partialorder %v1240_v41, 0.0  ;;  %v1368_v55 = vmul.f32 0.1, %v1240_v41 }
  0xf7   : > { %v795_v57 = vpop.f32.mrf.mxu0  ;;  %v835_v58 = vpop.f32.mrf.mxu1  ;;  %v974_v14 = vadd.f32 %v872_v51, %v421_v1  ;;  %v990_v26 = vadd.f32 %v912_v52, %v437_v6  ;;  %1576 = vst.msk [vmem:[%s2392_s30 + $0xd0] sm:$0xf] %vm1523_vm2, %v1511_v29  ;;  %v1141_v42 = vmul.f32 %v2360_v45, %v1073_v38  ;;  %v1089_v43 = vld [vmem:[#allocation2 + $0xb0] sm:$0xff]  ;;  %v1416_v52 = vsel %vm1288_vm9, %v1224_v31, %v1352_v40 }
  0xf8   : > { %v943_v27 = vadd.f32 %v795_v57, %v390_v9  ;;  %v959_v7 = vadd.f32 %v835_v58, %v406_v10  ;;  %1529 = vst.msk [vmem:[%s2392_s30 + $0x14] sm:$0xf] %vm1523_vm2, %v1464_v36  ;;  %v1256_v47 = vadd.f32 %v2369_v50, %v1188_v37  ;;  %v1157_v48 = vmul.f32 %v2360_v45, %v1089_v43  ;;  %v1105_v16 = vld [vmem:[#allocation2 + $0x130] sm:$0xff] }
  0xf9   : > { %1039 = vst.msk [vmem:[#allocation2 + $0x138] sm:$0xff] %vm317_vm0, %v974_v14  ;;  %v1209_v44 = vadd.f32 %v2369_v50, %v1141_v42  ;;  %v1480_v56 = vpack.c.bf16 %v1416_v52, %v1416_v52  ;;  %v1121_v59 = vld [vmem:[#allocation2 + $0x1b0] sm:$0xff]  ;;  %v1432_v46 = vsel %vm1304_vm10, %v1240_v41, %v1368_v55  ;;  %v1173_v61 = vmul.f32 %v2360_v45, %v1105_v16  ;;  %v439_v42 = vld [vmem:[#allocation2 + $0x1c8] sm:$0xff] }
  0xfa   : > { %1055 = vst.msk [vmem:[#allocation2 + $0x1b8] sm:$0xff] %vm317_vm0, %v990_v26  ;;  %vm1320_vm11 = vcmp.gt.f32.partialorder %v1256_v47, 0.0  ;;  %v1384_v57 = vmul.f32 0.1, %v1256_v47  ;;  %v1225_v58 = vadd.f32 %v2369_v50, %v1157_v48  ;;  %v1074_v53 = vld [vmem:[#allocation2 + $0x38] sm:$0xff]  ;;  %v1496_v54 = vpack.c.bf16 %v1432_v46, %v1432_v46 }
  0xfb   : > { %1008 = vst.msk [vmem:[#allocation2 + $0x40] sm:$0xff] %vm317_vm0, %v943_v27  ;;  %vm1273_vm12 = vcmp.gt.f32.partialorder %v1209_v44, 0.0  ;;  %v1337_v60 = vmul.f32 0.1, %v1209_v44  ;;  %v1090_v62 = vld [vmem:[#allocation2 + $0xb8] sm:$0xff]  ;;  %v1241_v6 = vadd.f32 %v2369_v50, %v1173_v61  ;;  %v1189_v9 = vmul.f32 %v2360_v45, %v1121_v59 }
  0xfc   : > { %1024 = vst.msk [vmem:[#allocation2 + $0xc0] sm:$0xff] %vm317_vm0, %v959_v7  ;;  %v1448_v1 = vsel %vm1320_vm11, %v1256_v47, %v1384_v57  ;;  %vm1289_vm13 = vcmp.gt.f32.partialorder %v1225_v58, 0.0  ;;  %v1353_v2 = vmul.f32 0.1, %v1225_v58  ;;  %v1142_v14 = vmul.f32 %v2360_v45, %v1074_v53 }
  0xfd   : > { %1545 = vst.msk [vmem:[%s2392_s30 + $0x54] sm:$0xf] %vm1523_vm2, %v1480_v56  ;;  %v1512_v4 = vpack.c.bf16 %v1448_v1, %v1448_v1  ;;  %v1401_v5 = vsel %vm1273_vm12, %v1209_v44, %v1337_v60  ;;  %v1158_v17 = vmul.f32 %v2360_v45, %v1090_v62  ;;  %vm1305_vm14 = vcmp.gt.f32.partialorder %v1241_v6, 0.0 }
  0xfe   : > { %v875_v21 = vpop.f32.mrf.mxu2  ;;  %v915_v23 = vpop.f32.mrf.mxu3  ;;  %1561 = vst.msk [vmem:[%s2392_s30 + $0x94] sm:$0xf] %vm1523_vm2, %v1496_v54  ;;  %v1465_v12 = vpack.c.bf16 %v1401_v5, %v1401_v5  ;;  %v1417_v13 = vsel %vm1289_vm13, %v1225_v58, %v1353_v2  ;;  %v408_v5 = vld [vmem:[#allocation2 + $0xd0] sm:$0xff] }
  0xff   : > { %v797_v8 = vpop.f32.mrf.mxu0  ;;  %v837_v28 = vpop.f32.mrf.mxu1  ;;  %v975_v15 = vadd.f32 %v875_v21, %v422_v20  ;;  %v2542_v39 = vadd.f32 %v915_v23, %v438_v22  ;;  %1577 = vst.msk [vmem:[%s2392_s30 + $0xd4] sm:$0xf] %vm1523_vm2, %v1512_v4  ;;  %v1481_v19 = vpack.c.bf16 %v1417_v13, %v1417_v13  ;;  %v1369_v20 = vmul.f32 0.1, %v1241_v6 }
 0x100   : > { %v2552_v49 = vadd.f32 %v797_v8, %v391_v34  ;;  %v2554_v51 = vadd.f32 %v837_v28, %v407_v35  ;;  %v1106_v10 = vld [vmem:[#allocation2 + $0x138] sm:$0xff]  ;;  %v1257_v21 = vadd.f32 %v2369_v50, %v1189_v9  ;;  %1530 = vst.msk [vmem:[%s2392_s30 + $0x18] sm:$0xf] %vm1523_vm2, %v1465_v12  ;;  %v1210_v22 = vadd.f32 %v2369_v50, %v1142_v14 }
 0x101   : > { %1040 = vst.msk [vmem:[#allocation2 + $0x140] sm:$0xff] %vm317_vm0, %v975_v15  ;;  %v1226_v23 = vadd.f32 %v2369_v50, %v1158_v17  ;;  %v1174_v24 = vmul.f32 %v2360_v45, %v1106_v10  ;;  %v1122_v25 = vld [vmem:[#allocation2 + $0x1b8] sm:$0xff]  ;;  %v1433_v27 = vsel %vm1305_vm14, %v1241_v6, %v1369_v20  ;;  %v424_v6 = vld [vmem:[#allocation2 + $0x150] sm:$0xff] }
 0x102   : > { %1546 = vst.msk [vmem:[%s2392_s30 + $0x58] sm:$0xf] %vm1523_vm2, %v1481_v19  ;;  %vm1321_vm15 = vcmp.gt.f32.partialorder %v1257_v21, 0.0  ;;  %v1385_v7 = vmul.f32 0.1, %v1257_v21  ;;  %v1190_v8 = vmul.f32 %v2360_v45, %v1122_v25  ;;  %v1075_v28 = vld [vmem:[#allocation2 + $0x40] sm:$0xff]  ;;  %v1497_v29 = vpack.c.bf16 %v1433_v27, %v1433_v27 }
 0x103   : > { %vm1274_vm1 = vcmp.gt.f32.partialorder %v1210_v22, 0.0  ;;  %v1338_v30 = vmul.f32 0.1, %v1210_v22  ;;  %vm1290_vm3 = vcmp.gt.f32.partialorder %v1226_v23, 0.0  ;;  %v1091_v31 = vld [vmem:[#allocation2 + $0xc0] sm:$0xff]  ;;  %1056 = vst.msk [vmem:[#allocation2 + $0x1c0] sm:$0xff] %vm317_vm0, %v2542_v39  ;;  %v1242_v34 = vadd.f32 %v2369_v50, %v1174_v24 }
 0x104   : > { %v1449_v32 = vsel %vm1321_vm15, %v1257_v21, %v1385_v7  ;;  %v1354_v33 = vmul.f32 0.1, %v1226_v23  ;;  %v1258_v35 = vadd.f32 %v2369_v50, %v1190_v8  ;;  %1009 = vst.msk [vmem:[#allocation2 + $0x48] sm:$0xff] %vm317_vm0, %v2552_v49  ;;  %v1143_v39 = vmul.f32 %v2360_v45, %v1075_v28  ;;  %v393_v8 = vld [vmem:[#allocation2 + $0x58] sm:$0xff] }
 0x105   : > { %1562 = vst.msk [vmem:[%s2392_s30 + $0x98] sm:$0xf] %vm1523_vm2, %v1497_v29  ;;  %v1513_v38 = vpack.c.bf16 %v1449_v32, %v1449_v32  ;;  %v1402_v15 = vsel %vm1274_vm1, %v1210_v22, %v1338_v30  ;;  %v1159_v40 = vmul.f32 %v2360_v45, %v1091_v31  ;;  %vm1306_vm4 = vcmp.gt.f32.partialorder %v1242_v34, 0.0 }
 0x106   : > { %v877_v63 = vpop.f32.mrf.mxu2  ;;  %v2562_v0 = vpop.f32.mrf.mxu3  ;;  %v1466_v43 = vpack.c.bf16 %v1402_v15, %v1402_v15  ;;  %v1418_v47 = vsel %vm1290_vm3, %v1226_v23, %v1354_v33  ;;  %v1370_v48 = vmul.f32 0.1, %v1242_v34  ;;  %1025 = vst.msk [vmem:[#allocation2 + $0xc8] sm:$0xff] %vm317_vm0, %v2554_v51  ;;  %vm1322_vm5 = vcmp.gt.f32.partialorder %v1258_v35, 0.0  ;;  %v392_v51 = vld [vmem:[#allocation2 + $0x50] sm:$0xff] }
 0x107   : > { %v2567_v3 = vpop.f32.mrf.mxu0  ;;  %v2576_v18 = vpop.f32.mrf.mxu1  ;;  %v976_v26 = vadd.f32 %v877_v63, %v423_v11  ;;  %1578 = vst.msk [vmem:[%s2392_s30 + $0xd8] sm:$0xf] %vm1523_vm2, %v1513_v38  ;;  %v1482_v49 = vpack.c.bf16 %v1418_v47, %v1418_v47  ;;  %v1386_v52 = vmul.f32 0.1, %v1258_v35  ;;  %v1211_v55 = vadd.f32 %v2369_v50, %v1143_v39  ;;  %v440_v23 = vld [vmem:[#allocation2 + $0x1d0] sm:$0xff]  ;;  %v425_v38 = vld [vmem:[#allocation2 + $0x158] sm:$0xff] }
 0x108   : > { %v1107_v41 = vld [vmem:[#allocation2 + $0x140] sm:$0xff]  ;;  %1531 = vst.msk [vmem:[%s2392_s30 + $0x1c] sm:$0xf] %vm1523_vm2, %v1466_v43  ;;  %v1434_v44 = vsel %vm1306_vm4, %v1242_v34, %v1370_v48  ;;  %v1227_v56 = vadd.f32 %v2369_v50, %v1159_v40  ;;  %v992_v58 = vadd.f32 %v2562_v0, %v439_v42  ;;  %v945_v4 = vadd.f32 %v2567_v3, %v392_v51 }
 0x109   : > { %v1175_v57 = vmul.f32 %v2360_v45, %v1107_v41  ;;  %1547 = vst.msk [vmem:[%s2392_s30 + $0x5c] sm:$0xf] %vm1523_vm2, %v1482_v49  ;;  %v1498_v59 = vpack.c.bf16 %v1434_v44, %v1434_v44  ;;  %v1450_v46 = vsel %vm1322_vm5, %v1258_v35, %v1386_v52  ;;  %vm1275_vm6 = vcmp.gt.f32.partialorder %v1211_v55, 0.0  ;;  %v409_v35 = vld [vmem:[#allocation2 + $0xd8] sm:$0xff] }
 0x10a   : > { %v1339_v60 = vmul.f32 0.1, %v1211_v55  ;;  %v1514_v53 = vpack.c.bf16 %v1450_v46, %v1450_v46  ;;  %vm1291_vm7 = vcmp.gt.f32.partialorder %v1227_v56, 0.0  ;;  %v1355_v62 = vmul.f32 0.1, %v1227_v56  ;;  %v1123_v54 = vld [vmem:[#allocation2 + $0x1c0] sm:$0xff] }
 0x10b   : > { %v1243_v63 = vadd.f32 %v2369_v50, %v1175_v57  ;;  %1041 = vst.msk [vmem:[#allocation2 + $0x148] sm:$0xff] %vm317_vm0, %v976_v26  ;;  %v1191_v1 = vmul.f32 %v2360_v45, %v1123_v54  ;;  %v1076_v2 = vld [vmem:[#allocation2 + $0x48] sm:$0xff]  ;;  %v961_v21 = vadd.f32 %v2576_v18, %v408_v5  ;;  %v441_v49 = vld [vmem:[#allocation2 + $0x1d8] sm:$0xff]  ;;  %v410_v46 = vld [vmem:[#allocation2 + $0xe0] sm:$0xff] }
 0x10c   : > { %1563 = vst.msk [vmem:[%s2392_s30 + $0x9c] sm:$0xf] %vm1523_vm2, %v1498_v59  ;;  %v1403_v0 = vsel %vm1275_vm6, %v1211_v55, %v1339_v60  ;;  %v1419_v10 = vsel %vm1291_vm7, %v1227_v56, %v1355_v62  ;;  %v1144_v17 = vmul.f32 %v2360_v45, %v1076_v2  ;;  %v394_v56 = vld [vmem:[#allocation2 + $0x60] sm:$0xff] }
 0x10d   : > { %1579 = vst.msk [vmem:[%s2392_s30 + $0xdc] sm:$0xf] %vm1523_vm2, %v1514_v53  ;;  %v1467_v9 = vpack.c.bf16 %v1403_v0, %v1403_v0  ;;  %vm1307_vm8 = vcmp.gt.f32.partialorder %v1243_v63, 0.0  ;;  %v1371_v11 = vmul.f32 0.1, %v1243_v63  ;;  %v1483_v13 = vpack.c.bf16 %v1419_v10, %v1419_v10  ;;  %v1092_v19 = vld [vmem:[#allocation2 + $0xc8] sm:$0xff] }
 0x10e   : > { %v880_v36 = vpop.f32.mrf.mxu2  ;;  %v2595_v37 = vpop.f32.mrf.mxu3  ;;  %v1259_v14 = vadd.f32 %v2369_v50, %v1191_v1  ;;  %1057 = vst.msk [vmem:[#allocation2 + $0x1c8] sm:$0xff] %vm317_vm0, %v992_v58  ;;  %v1160_v20 = vmul.f32 %v2360_v45, %v1092_v19  ;;  %v1212_v27 = vadd.f32 %v2369_v50, %v1144_v17  ;;  %v426_v60 = vld [vmem:[#allocation2 + $0x160] sm:$0xff] }
 0x10f   : > { %v2604_v16 = vpop.f32.mrf.mxu0  ;;  %v2616_v61 = vpop.f32.mrf.mxu1  ;;  %1532 = vst.msk [vmem:[%s2392_s30 + $0x20] sm:$0xf] %vm1523_vm2, %v1467_v9  ;;  %v1435_v3 = vsel %vm1307_vm8, %v1243_v63, %v1371_v11  ;;  %v977_v22 = vadd.f32 %v880_v36, %v424_v6  ;;  %v993_v31 = vadd.f32 %v2595_v37, %v440_v23  ;;  %v2667_v54 = vld [vmem:[%s2807_s3] ss:$0 sm:$0xff] }
 0x110   : > { %1548 = vst.msk [vmem:[%s2392_s30 + $0x60] sm:$0xf] %vm1523_vm2, %v1483_v13  ;;  %v1499_v25 = vpack.c.bf16 %v1435_v3, %v1435_v3  ;;  %vm1323_vm9 = vcmp.gt.f32.partialorder %v1259_v14, 0.0  ;;  %v1387_v26 = vmul.f32 0.1, %v1259_v14  ;;  %v1228_v7 = vadd.f32 %v2369_v50, %v1160_v20  ;;  %v442_v11 = vld [vmem:[#allocation2 + $0x1e0] sm:$0xff] }
 0x111   : > { %1010 = vst.msk [vmem:[#allocation2 + $0x50] sm:$0xff] %vm317_vm0, %v945_v4  ;;  %vm1276_vm10 = vcmp.gt.f32.partialorder %v1212_v27, 0.0  ;;  %v1340_v29 = vmul.f32 0.1, %v1212_v27  ;;  %v946_v42 = vadd.f32 %v2604_v16, %v393_v8  ;;  %v962_v48 = vadd.f32 %v2616_v61, %v409_v35  ;;  %v395_v20 = vld [vmem:[#allocation2 + $0x68] sm:$0xff] }
 0x112   : > { %1564 = vst.msk [vmem:[%s2392_s30 + $0xa0] sm:$0xf] %vm1523_vm2, %v1499_v25  ;;  %v1451_v18 = vsel %vm1323_vm9, %v1259_v14, %v1387_v26  ;;  %v1108_v30 = vld [vmem:[#allocation2 + $0x148] sm:$0xff]  ;;  %vm1292_vm11 = vcmp.gt.f32.partialorder %v1228_v7, 0.0  ;;  %v1356_v33 = vmul.f32 0.1, %v1228_v7 }
 0x113   : > { %v1515_v32 = vpack.c.bf16 %v1451_v18, %v1451_v18  ;;  %v1176_v34 = vmul.f32 %v2360_v45, %v1108_v30  ;;  %1026 = vst.msk [vmem:[#allocation2 + $0xd0] sm:$0xff] %vm317_vm0, %v961_v21  ;;  %v1404_v36 = vsel %vm1276_vm10, %v1212_v27, %v1340_v29 }
 0x114   : > { %1042 = vst.msk [vmem:[#allocation2 + $0x150] sm:$0xff] %vm317_vm0, %v977_v22  ;;  %v1468_v39 = vpack.c.bf16 %v1404_v36, %v1404_v36  ;;  %v1420_v40 = vsel %vm1292_vm11, %v1228_v7, %v1356_v33 }
 0x115   : > { %1580 = vst.msk [vmem:[%s2392_s30 + $0xe0] sm:$0xf] %vm1523_vm2, %v1515_v32  ;;  %v1244_v37 = vadd.f32 %v2369_v50, %v1176_v34  ;;  %v1124_v41 = vld [vmem:[#allocation2 + $0x1c8] sm:$0xff]  ;;  %v1484_v43 = vpack.c.bf16 %v1420_v40, %v1420_v40 }
 0x116   : > { %v882_v12 = vpop.f32.mrf.mxu2  ;;  %v922_v24 = vpop.f32.mrf.mxu3  ;;  %v1192_v47 = vmul.f32 %v2360_v45, %v1124_v41  ;;  %1058 = vst.msk [vmem:[#allocation2 + $0x1d0] sm:$0xff] %vm317_vm0, %v993_v31  ;;  %v2659_v45 = vld [vmem:[%s2806_s2] ss:$0 sm:$0xff]  ;;  %v411_v31 = vld [vmem:[#allocation2 + $0xe8] sm:$0xff] }
 0x117   : > { %v805_v28 = vpop.f32.mrf.mxu0  ;;  %v845_v15 = vpop.f32.mrf.mxu1  ;;  %1533 = vst.msk [vmem:[%s2392_s30 + $0x24] sm:$0xf] %vm1523_vm2, %v1468_v39  ;;  %vm1308_vm12 = vcmp.gt.f32.partialorder %v1244_v37, 0.0  ;;  %v1372_v55 = vmul.f32 0.1, %v1244_v37  ;;  %v978_v44 = vadd.f32 %v882_v12, %v425_v38  ;;  %v994_v59 = vadd.f32 %v922_v24, %v441_v49  ;;  %v427_v32 = vld [vmem:[#allocation2 + $0x168] sm:$0xff] }
 0x118   : > { %1549 = vst.msk [vmem:[%s2392_s30 + $0x64] sm:$0xf] %vm1523_vm2, %v1484_v43  ;;  %v1260_v57 = vadd.f32 %v2369_v50, %v1192_v47  ;;  %v1077_v16 = vld [vmem:[#allocation2 + $0x50] sm:$0xff]  ;;  %v947_v63 = vadd.f32 %v805_v28, %v394_v56  ;;  %v963_v9 = vadd.f32 %v845_v15, %v410_v46 }
 0x119   : > { %v1436_v58 = vsel %vm1308_vm12, %v1244_v37, %v1372_v55  ;;  %v1145_v51 = vmul.f32 %v2659_v45, %v1077_v16  ;;  %1011 = vst.msk [vmem:[#allocation2 + $0x58] sm:$0xff] %vm317_vm0, %v946_v42  ;;  %v443_v37 = vld [vmem:[#allocation2 + $0x1e8] sm:$0xff]  ;;  %v396_v49 = vld [vmem:[#allocation2 + $0x70] sm:$0xff] }
 0x11a   : > { %v1500_v53 = vpack.c.bf16 %v1436_v58, %v1436_v58  ;;  %vm1324_vm13 = vcmp.gt.f32.partialorder %v1260_v57, 0.0  ;;  %v1388_v62 = vmul.f32 0.1, %v1260_v57  ;;  %v1093_v50 = vld [vmem:[#allocation2 + $0xd0] sm:$0xff]  ;;  %1027 = vst.msk [vmem:[#allocation2 + $0xd8] sm:$0xff] %vm317_vm0, %v962_v48 }
 0x11b   : > { %v1213_v0 = vadd.f32 %v2667_v54, %v1145_v51  ;;  %v1161_v1 = vmul.f32 %v2659_v45, %v1093_v50  ;;  %v1109_v2 = vld [vmem:[#allocation2 + $0x150] sm:$0xff]  ;;  %1043 = vst.msk [vmem:[#allocation2 + $0x158] sm:$0xff] %vm317_vm0, %v978_v44 }
 0x11c   : > { %1565 = vst.msk [vmem:[%s2392_s30 + $0xa4] sm:$0xf] %vm1523_vm2, %v1500_v53  ;;  %v1452_v5 = vsel %vm1324_vm13, %v1260_v57, %v1388_v62  ;;  %v1177_v6 = vmul.f32 %v2659_v45, %v1109_v2 }
 0x11d   : > { %v1516_v12 = vpack.c.bf16 %v1452_v5, %v1452_v5  ;;  %vm1277_vm14 = vcmp.gt.f32.partialorder %v1213_v0, 0.0  ;;  %v1341_v13 = vmul.f32 0.1, %v1213_v0  ;;  %v1229_v14 = vadd.f32 %v2667_v54, %v1161_v1  ;;  %v1125_v17 = vld [vmem:[#allocation2 + $0x1d0] sm:$0xff]  ;;  %1059 = vst.msk [vmem:[#allocation2 + $0x1d8] sm:$0xff] %vm317_vm0, %v994_v59 }
 0x11e   : > { %v885_v52 = vpop.f32.mrf.mxu2  ;;  %v925_v61 = vpop.f32.mrf.mxu3  ;;  %v1245_v19 = vadd.f32 %v2667_v54, %v1177_v6  ;;  %v1193_v3 = vmul.f32 %v2659_v45, %v1125_v17  ;;  %1012 = vst.msk [vmem:[#allocation2 + $0x60] sm:$0xff] %vm317_vm0, %v947_v63 }
 0x11f   : > { %v807_v4 = vpop.f32.mrf.mxu0  ;;  %v979_v10 = vadd.f32 %v885_v52, %v426_v60  ;;  %v847_v21 = vpop.f32.mrf.mxu1  ;;  %1581 = vst.msk [vmem:[%s2392_s30 + $0xe4] sm:$0xf] %vm1523_vm2, %v1516_v12  ;;  %v1405_v22 = vsel %vm1277_vm14, %v1213_v0, %v1341_v13  ;;  %vm1293_vm15 = vcmp.gt.f32.partialorder %v1229_v14, 0.0  ;;  %v1357_v23 = vmul.f32 0.1, %v1229_v14 }
 0x120   : > { %v995_v24 = vadd.f32 %v925_v61, %v442_v11  ;;  %v1469_v25 = vpack.c.bf16 %v1405_v22, %v1405_v22  ;;  %vm1309_vm1 = vcmp.gt.f32.partialorder %v1245_v19, 0.0  ;;  %v1373_v26 = vmul.f32 0.1, %v1245_v19  ;;  %v1078_v7 = vld [vmem:[#allocation2 + $0x58] sm:$0xff]  ;;  %1028 = vst.msk [vmem:[#allocation2 + $0xe0] sm:$0xff] %vm317_vm0, %v963_v9  ;;  %v412_v9 = vld [vmem:[#allocation2 + $0xf0] sm:$0xff] }
 0x121   : > { %v1261_v27 = vadd.f32 %v2667_v54, %v1193_v3  ;;  %v1421_v28 = vsel %vm1293_vm15, %v1229_v14, %v1357_v23  ;;  %v1146_v18 = vmul.f32 %v2659_v45, %v1078_v7  ;;  %v1094_v29 = vld [vmem:[#allocation2 + $0xd8] sm:$0xff]  ;;  %1044 = vst.msk [vmem:[#allocation2 + $0x160] sm:$0xff] %vm317_vm0, %v979_v10  ;;  %v948_v30 = vadd.f32 %v807_v4, %v395_v20 }
 0x122   : > { %1534 = vst.msk [vmem:[%s2392_s30 + $0x28] sm:$0xf] %vm1523_vm2, %v1469_v25  ;;  %v1485_v33 = vpack.c.bf16 %v1421_v28, %v1421_v28  ;;  %v1437_v34 = vsel %vm1309_vm1, %v1245_v19, %v1373_v26  ;;  %v1110_v36 = vld [vmem:[#allocation2 + $0x158] sm:$0xff]  ;;  %v1162_v39 = vmul.f32 %v2659_v45, %v1094_v29  ;;  %v964_v47 = vadd.f32 %v847_v21, %v411_v31 }
 0x123   : > { %vm1325_vm3 = vcmp.gt.f32.partialorder %v1261_v27, 0.0  ;;  %v1389_v35 = vmul.f32 0.1, %v1261_v27  ;;  %v1501_v38 = vpack.c.bf16 %v1437_v34, %v1437_v34  ;;  %v1214_v15 = vadd.f32 %v2667_v54, %v1146_v18  ;;  %1060 = vst.msk [vmem:[#allocation2 + $0x1e0] sm:$0xff] %vm317_vm0, %v995_v24  ;;  %v428_v24 = vld [vmem:[#allocation2 + $0x170] sm:$0xff] }
 0x124   : > { %v1178_v40 = vmul.f32 %v2659_v45, %v1110_v36  ;;  %1550 = vst.msk [vmem:[%s2392_s30 + $0x68] sm:$0xf] %vm1523_vm2, %v1485_v33  ;;  %v1126_v43 = vld [vmem:[#allocation2 + $0x1d8] sm:$0xff]  ;;  %v1230_v44 = vadd.f32 %v2667_v54, %v1162_v39  ;;  %v444_v34 = vld [vmem:[#allocation2 + $0x1f0] sm:$0xff] }
 0x125   : > { %v1453_v42 = vsel %vm1325_vm3, %v1261_v27, %v1389_v35  ;;  %1566 = vst.msk [vmem:[%s2392_s30 + $0xa8] sm:$0xf] %vm1523_vm2, %v1501_v38  ;;  %vm1278_vm4 = vcmp.gt.f32.partialorder %v1214_v15, 0.0  ;;  %v1342_v55 = vmul.f32 0.1, %v1214_v15  ;;  %v1079_v56 = vld [vmem:[#allocation2 + $0x60] sm:$0xff]  ;;  %v1194_v58 = vmul.f32 %v2659_v45, %v1126_v43 }
 0x126   : > { %v887_v8 = vpop.f32.mrf.mxu2  ;;  %v927_v41 = vpop.f32.mrf.mxu3  ;;  %v1517_v52 = vpack.c.bf16 %v1453_v42, %v1453_v42  ;;  %v1246_v16 = vadd.f32 %v2667_v54, %v1178_v40  ;;  %v1147_v51 = vmul.f32 %v2659_v45, %v1079_v56  ;;  %1013 = vst.msk [vmem:[#allocation2 + $0x68] sm:$0xff] %vm317_vm0, %v948_v30  ;;  %vm1294_vm5 = vcmp.gt.f32.partialorder %v1230_v44, 0.0  ;;  %v397_v35 = vld [vmem:[#allocation2 + $0x78] sm:$0xff] }
 0x127   : > { %v980_v48 = vadd.f32 %v887_v8, %v427_v32  ;;  %v810_v57 = vpop.f32.mrf.mxu0  ;;  %v996_v59 = vadd.f32 %v927_v41, %v443_v37  ;;  %v1406_v46 = vsel %vm1278_vm4, %v1214_v15, %v1342_v55  ;;  %v1358_v60 = vmul.f32 0.1, %v1230_v44  ;;  %v1095_v61 = vld [vmem:[#allocation2 + $0xe0] sm:$0xff]  ;;  %1029 = vst.msk [vmem:[#allocation2 + $0xe8] sm:$0xff] %vm317_vm0, %v964_v47  ;;  %v850_v1 = vpop.f32.mrf.mxu1  ;;  %v413_v55 = vld [vmem:[#allocation2 + $0xf8] sm:$0xff] }
 0x128   : > { %1582 = vst.msk [vmem:[%s2392_s30 + $0xe8] sm:$0xf] %vm1523_vm2, %v1517_v52  ;;  %v949_v53 = vadd.f32 %v810_v57, %v396_v49  ;;  %v1470_v62 = vpack.c.bf16 %v1406_v46, %v1406_v46  ;;  %vm1310_vm6 = vcmp.gt.f32.partialorder %v1246_v16, 0.0  ;;  %v1374_v50 = vmul.f32 0.1, %v1246_v16  ;;  %v1111_v0 = vld [vmem:[#allocation2 + $0x160] sm:$0xff] }
 0x129   : > { %v1262_v63 = vadd.f32 %v2667_v54, %v1194_v58  ;;  %v1422_v2 = vsel %vm1294_vm5, %v1230_v44, %v1358_v60  ;;  %v1215_v4 = vadd.f32 %v2667_v54, %v1147_v51  ;;  %v1163_v5 = vmul.f32 %v2659_v45, %v1095_v61  ;;  %1045 = vst.msk [vmem:[#allocation2 + $0x168] sm:$0xff] %vm317_vm0, %v980_v48 }
 0x12a   : > { %v1179_v6 = vmul.f32 %v2659_v45, %v1111_v0  ;;  %1535 = vst.msk [vmem:[%s2392_s30 + $0x2c] sm:$0xf] %vm1523_vm2, %v1470_v62  ;;  %v1486_v10 = vpack.c.bf16 %v1422_v2, %v1422_v2  ;;  %v1438_v11 = vsel %vm1310_vm6, %v1246_v16, %v1374_v50  ;;  %v1127_v13 = vld [vmem:[#allocation2 + $0x1e0] sm:$0xff]  ;;  %v965_v23 = vadd.f32 %v850_v1, %v412_v9 }
 0x12b   : > { %vm1326_vm7 = vcmp.gt.f32.partialorder %v1262_v63, 0.0  ;;  %v1390_v12 = vmul.f32 0.1, %v1262_v63  ;;  %v1502_v17 = vpack.c.bf16 %v1438_v11, %v1438_v11  ;;  %vm1279_vm8 = vcmp.gt.f32.partialorder %v1215_v4, 0.0  ;;  %1061 = vst.msk [vmem:[#allocation2 + $0x1e8] sm:$0xff] %vm317_vm0, %v996_v59  ;;  %v429_v59 = vld [vmem:[#allocation2 + $0x178] sm:$0xff] }
 0x12c   : > { %v1343_v19 = vmul.f32 0.1, %v1215_v4  ;;  %v1231_v3 = vadd.f32 %v2667_v54, %v1163_v5  ;;  %1551 = vst.msk [vmem:[%s2392_s30 + $0x6c] sm:$0xf] %vm1523_vm2, %v1486_v10  ;;  %v1247_v21 = vadd.f32 %v2667_v54, %v1179_v6  ;;  %v1195_v22 = vmul.f32 %v2659_v45, %v1127_v13  ;;  %v445_v5 = vld [vmem:[#allocation2 + $0x1f8] sm:$0xff] }
 0x12d   : > { %v1454_v20 = vsel %vm1326_vm7, %v1262_v63, %v1390_v12  ;;  %1567 = vst.msk [vmem:[%s2392_s30 + $0xac] sm:$0xf] %vm1523_vm2, %v1502_v17  ;;  %v1080_v7 = vld [vmem:[#allocation2 + $0x68] sm:$0xff] }
 0x12e   : > { %v890_v14 = vpop.f32.mrf.mxu2  ;;  %v1518_v25 = vpack.c.bf16 %v1454_v20, %v1454_v20  ;;  %v1407_v26 = vsel %vm1279_vm8, %v1215_v4, %v1343_v19  ;;  %vm1295_vm9 = vcmp.gt.f32.partialorder %v1231_v3, 0.0  ;;  %v1359_v27 = vmul.f32 0.1, %v1231_v3  ;;  %v930_v8 = vpop.f32.mrf.mxu3  ;;  %1014 = vst.msk [vmem:[#allocation2 + $0x70] sm:$0xff] %vm317_vm0, %v949_v53  ;;  %v1096_v32 = vld [vmem:[#allocation2 + $0xe8] sm:$0xff] }
 0x12f   : > { %v1471_v28 = vpack.c.bf16 %v1407_v26, %v1407_v26  ;;  %vm1311_vm10 = vcmp.gt.f32.partialorder %v1247_v21, 0.0  ;;  %v1375_v18 = vmul.f32 0.1, %v1247_v21  ;;  %v1263_v29 = vadd.f32 %v2667_v54, %v1195_v22  ;;  %v812_v36 = vpop.f32.mrf.mxu0  ;;  %1030 = vst.msk [vmem:[#allocation2 + $0xf0] sm:$0xff] %vm317_vm0, %v965_v23  ;;  %v852_v44 = vpop.f32.mrf.mxu1 }
 0x130   : > { %1583 = vst.msk [vmem:[%s2392_s30 + $0xec] sm:$0xf] %vm1523_vm2, %v1518_v25  ;;  %v1423_v30 = vsel %vm1295_vm9, %v1231_v3, %v1359_v27  ;;  %v1148_v31 = vmul.f32 %v2659_v45, %v1080_v7  ;;  %v981_v33 = vadd.f32 %v890_v14, %v428_v24  ;;  %v1112_v40 = vld [vmem:[#allocation2 + $0x168] sm:$0xff]  ;;  %v1164_v42 = vmul.f32 %v2659_v45, %v1096_v32 }
 0x131   : > { %1536 = vst.msk [vmem:[%s2392_s30 + $0x30] sm:$0xf] %vm1523_vm2, %v1471_v28  ;;  %v1487_v38 = vpack.c.bf16 %v1423_v30, %v1423_v30  ;;  %v1439_v15 = vsel %vm1311_vm10, %v1247_v21, %v1375_v18  ;;  %vm1327_vm11 = vcmp.gt.f32.partialorder %v1263_v29, 0.0  ;;  %v1391_v39 = vmul.f32 0.1, %v1263_v29 }
 0x132   : > { %v1503_v37 = vpack.c.bf16 %v1439_v15, %v1439_v15  ;;  %v1216_v41 = vadd.f32 %v2667_v54, %v1148_v31  ;;  %v1180_v43 = vmul.f32 %v2659_v45, %v1112_v40  ;;  %v1128_v48 = vld [vmem:[#allocation2 + $0x1e8] sm:$0xff]  ;;  %v997_v49 = vadd.f32 %v930_v8, %v444_v34  ;;  %1046 = vst.msk [vmem:[#allocation2 + $0x170] sm:$0xff] %vm317_vm0, %v981_v33 }
 0x133   : > { %1552 = vst.msk [vmem:[%s2392_s30 + $0x70] sm:$0xf] %vm1523_vm2, %v1487_v38  ;;  %v1455_v47 = vsel %vm1327_vm11, %v1263_v29, %v1391_v39  ;;  %v950_v52 = vadd.f32 %v812_v36, %v397_v35  ;;  %v1232_v16 = vadd.f32 %v2667_v54, %v1164_v42  ;;  %v1196_v51 = vmul.f32 %v2659_v45, %v1128_v48 }
 0x134   : > { %1568 = vst.msk [vmem:[%s2392_s30 + $0xb0] sm:$0xf] %vm1523_vm2, %v1503_v37  ;;  %v1519_v56 = vpack.c.bf16 %v1455_v47, %v1455_v47  ;;  %vm1280_vm12 = vcmp.gt.f32.partialorder %v1216_v41, 0.0  ;;  %v1344_v57 = vmul.f32 0.1, %v1216_v41  ;;  %v1248_v58 = vadd.f32 %v2667_v54, %v1180_v43 }
 0x135   : > { %vm1296_vm13 = vcmp.gt.f32.partialorder %v1232_v16, 0.0  ;;  %v1360_v61 = vmul.f32 0.1, %v1232_v16  ;;  %v1081_v53 = vld [vmem:[#allocation2 + $0x70] sm:$0xff]  ;;  %v966_v62 = vadd.f32 %v852_v44, %v413_v55  ;;  %v1264_v0 = vadd.f32 %v2667_v54, %v1196_v51  ;;  %1062 = vst.msk [vmem:[#allocation2 + $0x1f0] sm:$0xff] %vm317_vm0, %v997_v49 }
 0x136   : > { %v892_v46 = vpop.f32.mrf.mxu2  ;;  %1584 = vst.msk [vmem:[%s2392_s30 + $0xf0] sm:$0xf] %vm1523_vm2, %v1519_v56  ;;  %v1408_v60 = vsel %vm1280_vm12, %v1216_v41, %v1344_v57  ;;  %vm1312_vm14 = vcmp.gt.f32.partialorder %v1248_v58, 0.0  ;;  %v1376_v63 = vmul.f32 0.1, %v1248_v58  ;;  %v1149_v2 = vmul.f32 %v2659_v45, %v1081_v53  ;;  %v932_v6 = vpop.f32.mrf.mxu3  ;;  %v1097_v12 = vld [vmem:[#allocation2 + $0xf0] sm:$0xff] }
 0x137   : > { %v1472_v50 = vpack.c.bf16 %v1408_v60, %v1408_v60  ;;  %v1424_v1 = vsel %vm1296_vm13, %v1232_v16, %v1360_v61  ;;  %1015 = vst.msk [vmem:[#allocation2 + $0x78] sm:$0xff] %vm317_vm0, %v950_v52  ;;  %v982_v4 = vadd.f32 %v892_v46, %v429_v59  ;;  %vm1328_vm15 = vcmp.gt.f32.partialorder %v1264_v0, 0.0 }
 0x138   : > { %v1488_v9 = vpack.c.bf16 %v1424_v1, %v1424_v1  ;;  %v1440_v10 = vsel %vm1312_vm14, %v1248_v58, %v1376_v63  ;;  %v1392_v11 = vmul.f32 0.1, %v1264_v0  ;;  %v1217_v14 = vadd.f32 %v2667_v54, %v1149_v2  ;;  %1031 = vst.msk [vmem:[#allocation2 + $0xf8] sm:$0xff] %vm317_vm0, %v966_v62 }
 0x139   : > { %1537 = vst.msk [vmem:[%s2392_s30 + $0x34] sm:$0xf] %vm1523_vm2, %v1472_v50  ;;  %v1504_v13 = vpack.c.bf16 %v1440_v10, %v1440_v10  ;;  %v1165_v17 = vmul.f32 %v2659_v45, %v1097_v12  ;;  %v998_v3 = vadd.f32 %v932_v6, %v445_v5  ;;  %v1113_v23 = vld [vmem:[#allocation2 + $0x170] sm:$0xff] }
 0x13a   : > { %1553 = vst.msk [vmem:[%s2392_s30 + $0x74] sm:$0xf] %vm1523_vm2, %v1488_v9  ;;  %v1456_v19 = vsel %vm1328_vm15, %v1264_v0, %v1392_v11  ;;  %vm1281_vm1 = vcmp.gt.f32.partialorder %v1217_v14, 0.0  ;;  %v1345_v21 = vmul.f32 0.1, %v1217_v14  ;;  %v1181_v24 = vmul.f32 %v2659_v45, %v1113_v23 }
 0x13b   : > { %1569 = vst.msk [vmem:[%s2392_s30 + $0xb4] sm:$0xf] %vm1523_vm2, %v1504_v13  ;;  %v1520_v20 = vpack.c.bf16 %v1456_v19, %v1456_v19  ;;  %v1233_v22 = vadd.f32 %v2667_v54, %v1165_v17 }
 0x13c   : > { %1047 = vst.msk [vmem:[#allocation2 + $0x178] sm:$0xff] %vm317_vm0, %v982_v4  ;;  %v1409_v25 = vsel %vm1281_vm1, %v1217_v14, %v1345_v21  ;;  %v1129_v27 = vld [vmem:[#allocation2 + $0x1f0] sm:$0xff]  ;;  %v1249_v8 = vadd.f32 %v2667_v54, %v1181_v24 }
 0x13d   : > { %1585 = vst.msk [vmem:[%s2392_s30 + $0xf4] sm:$0xf] %vm1523_vm2, %v1520_v20  ;;  %vm1297_vm3 = vcmp.gt.f32.partialorder %v1233_v22, 0.0  ;;  %v1361_v26 = vmul.f32 0.1, %v1233_v22  ;;  %v1473_v7 = vpack.c.bf16 %v1409_v25, %v1409_v25  ;;  %v1197_v28 = vmul.f32 %v2659_v45, %v1129_v27 }
 0x13e   : > { %v1082_v18 = vld [vmem:[#allocation2 + $0x78] sm:$0xff]  ;;  %1063 = vst.msk [vmem:[#allocation2 + $0x1f8] sm:$0xff] %vm317_vm0, %v998_v3  ;;  %vm1313_vm4 = vcmp.gt.f32.partialorder %v1249_v8, 0.0  ;;  %v1377_v32 = vmul.f32 0.1, %v1249_v8 }
 0x13f   : > { %v1425_v29 = vsel %vm1297_vm3, %v1233_v22, %v1361_v26  ;;  %v1150_v30 = vmul.f32 %v2659_v45, %v1082_v18  ;;  %1538 = vst.msk [vmem:[%s2392_s30 + $0x38] sm:$0xf] %vm1523_vm2, %v1473_v7  ;;  %v1265_v33 = vadd.f32 %v2667_v54, %v1197_v28  ;;  %v1098_v34 = vld [vmem:[#allocation2 + $0xf8] sm:$0xff] }
 0x140   : > { %v1489_v31 = vpack.c.bf16 %v1425_v29, %v1425_v29  ;;  %v1166_v36 = vmul.f32 %v2659_v45, %v1098_v34  ;;  %v1441_v38 = vsel %vm1313_vm4, %v1249_v8, %v1377_v32 }
 0x141   : > { %v1218_v35 = vadd.f32 %v2667_v54, %v1150_v30  ;;  %vm1329_vm0 = vcmp.gt.f32.partialorder %v1265_v33, 0.0  ;;  %v1393_v15 = vmul.f32 0.1, %v1265_v33  ;;  %v1505_v39 = vpack.c.bf16 %v1441_v38, %v1441_v38 }
 0x142   : > { %1554 = vst.msk [vmem:[%s2392_s30 + $0x78] sm:$0xf] %vm1523_vm2, %v1489_v31  ;;  %v1234_v37 = vadd.f32 %v2667_v54, %v1166_v36 }
 0x143   : > { %vm1282_vm5 = vcmp.gt.f32.partialorder %v1218_v35, 0.0  ;;  %v1346_v40 = vmul.f32 0.1, %v1218_v35  ;;  %v1114_v41 = vld [vmem:[#allocation2 + $0x178] sm:$0xff]  ;;  %v1457_v42 = vsel %vm1329_vm0, %v1265_v33, %v1393_v15  ;;  %1570 = vst.msk [vmem:[%s2392_s30 + $0xb8] sm:$0xf] %vm1523_vm2, %v1505_v39 }
 0x144   : > { %v1182_v43 = vmul.f32 %v2659_v45, %v1114_v41  ;;  %v1521_v47 = vpack.c.bf16 %v1457_v42, %v1457_v42  ;;  %vm1298_vm6 = vcmp.gt.f32.partialorder %v1234_v37, 0.0  ;;  %v1362_v49 = vmul.f32 0.1, %v1234_v37 }
 0x145   : > { %v1410_v48 = vsel %vm1282_vm5, %v1218_v35, %v1346_v40  ;;  %v1130_v52 = vld [vmem:[#allocation2 + $0x1f8] sm:$0xff] }
 0x146   : > { %v1474_v55 = vpack.c.bf16 %v1410_v48, %v1410_v48  ;;  %v1250_v44 = vadd.f32 %v2667_v54, %v1182_v43  ;;  %v1198_v56 = vmul.f32 %v2659_v45, %v1130_v52  ;;  %1586 = vst.msk [vmem:[%s2392_s30 + $0xf8] sm:$0xf] %vm1523_vm2, %v1521_v47  ;;  %v1426_v57 = vsel %vm1298_vm6, %v1234_v37, %v1362_v49 }
 0x147   : > { %v1490_v16 = vpack.c.bf16 %v1426_v57, %v1426_v57 }
 0x148   : > { %1539 = vst.msk [vmem:[%s2392_s30 + $0x3c] sm:$0xf] %vm1523_vm2, %v1474_v55  ;;  %vm1314_vm7 = vcmp.gt.f32.partialorder %v1250_v44, 0.0  ;;  %v1378_v58 = vmul.f32 0.1, %v1250_v44  ;;  %v1266_v51 = vadd.f32 %v2667_v54, %v1198_v56 }
 0x149   : > { %1555 = vst.msk [vmem:[%s2392_s30 + $0x7c] sm:$0xf] %vm1523_vm2, %v1490_v16 }
 0x14a   : > { %v1442_v59 = vsel %vm1314_vm7, %v1250_v44, %v1378_v58  ;;  %vm1330_vm8 = vcmp.gt.f32.partialorder %v1266_v51, 0.0  ;;  %v1394_v46 = vmul.f32 0.1, %v1266_v51 }
 0x14b   : > { %v1506_v60 = vpack.c.bf16 %v1442_v59, %v1442_v59 }
 0x14c   : > { %v1458_v61 = vsel %vm1330_vm8, %v1266_v51, %v1394_v46 }
 0x14d   : > { %1571 = vst.msk [vmem:[%s2392_s30 + $0xbc] sm:$0xf] %vm1523_vm2, %v1506_v60  ;;  %v1522_v45 = vpack.c.bf16 %v1458_v61, %v1458_v61 }
 0x14f   : > { %1587 = vst.msk [vmem:[%s2392_s30 + $0xfc] sm:$0xf] %vm1523_vm2, %v1522_v45 }
 0x150 PF: > { %s17_s20 = sadd.s32 1, %s2104_s20   ;;  %s2811_s15 = smov %s2088_s16 }
 0x151   : > { %p14_p0 = scmp.ge.s32.totalorder %s17_s20, 6   ;;  %s2812_s16 = smov %s2092_s17 }
 0x152   : > { %s2813_s17 = smov %s2183_s27  ;;  %s2814_s18 = smov %s2100_s19 }
 0x153   : > { %s2815_s19 = smov %s2817_s22  ;;  %16 = sbr.rel (!%p14_p0) target bundleno = 4 (0x4), region = 93 }
 0x158   :  { %1616 = vsyncpa [#allocation4], 1 }
 0x159   :  { %1618 = vsyncpa [#allocation4 + $0x1], 1 }

</bundles_post_ra>
